<compile_context>
chip_gen: v7x
topology: tpu7x:2x2x1
jax: 0.10.0
libtpu: 0.0.40
codegen_flags: <defaults>
</compile_context>

<pallas_src>
import jax
import jax.numpy as jnp
from jax.experimental import pallas as pl
from jax.experimental.pallas import tpu as pltpu


# --------------------------------------------------------------------------
# helpers
# --------------------------------------------------------------------------
def _round_up(x, m):
    return ((x + m - 1) // m) * m


def _vmem_limit_bytes():
    """3/4 of per-core VMEM (v7x ~48 MiB, v5e/v6e ~96 MiB); safe fallback."""
    cap = 64 * 1024 * 1024  # conservative fallback (safe on every generation)
    try:
        info = pltpu.get_tpu_info()
        cap = int(getattr(info, "vmem_capacity_bytes", cap)) or cap
    except Exception:
        pass
    return (cap // 4) * 3


def _choose_c_pad(c_out):
    """Lane-dense stored channel count; only pad when overhead is small."""
    padded = _round_up(c_out, 128)
    if padded == c_out or (padded - c_out) * 4 <= c_out:
        return padded
    return c_out  # accept a masked tail store instead of >25% extra HBM writes


def _choose_strip_rows(H, W, Cin, c1, c_pad, itemsize, vmem_limit):
    """Pick output rows per strip so the per-step working set fits the budget."""
    lane = lambda c: _round_up(c, 128)
    per_row = (
        W * (2 * Cin + 2 * c_pad) * itemsize      # double-buffered in/out blocks
        + W * lane(c_pad) * 4                     # f32 accumulator
        + W * lane(c1) * 4                        # squeeze f32 temp
        + (W + 2) * lane(c1) * itemsize           # padded squeeze strip
        + (W + 2) * lane(3 * c1) * itemsize       # dy-concat slab
        + W * lane(3 * c1) * itemsize             # one dx slab
    )
    budget = int(vmem_limit * 0.6)
    t = max(1, min(H, budget // max(per_row, 1)))
    while H % t:                                   # exact tiling keeps index math simple
        t -= 1
    return t


# --------------------------------------------------------------------------
# kernel
# --------------------------------------------------------------------------
def _fire_kernel(x_top_ref, x_mid_ref, x_bot_ref, w1_ref, b1_ref,
                 wcomb_ref, bcomb_ref, o_ref):
    # x_top/x_bot : (1, 1, W, Cin)  halo rows (clamped at the image border)
    # x_mid       : (1, tH, W, Cin) the strip's own rows
    # w1   : (Cin, c1)        b1    : (1, c1)     f32
    # wcomb: (3, 3*c1, c_pad) bcomb : (1, c_pad)  f32   (combined expand)
    # o    : (1, tH, W, c_pad)
    tH, W, Cin = x_mid_ref.shape[1], x_mid_ref.shape[2], x_mid_ref.shape[3]
    c1 = w1_ref.shape[1]
    c_pad = o_ref.shape[3]
    in_dtype = x_mid_ref.dtype

    s = pl.program_id(1)
    n_strips = pl.num_programs(1)

    w1 = w1_ref[...]
    b1 = b1_ref[...]

    def squeeze(x_flat):  # (rows, Cin) -> (rows, c1), relu, back to MXU dtype
        y = jnp.dot(x_flat, w1, preferred_element_type=jnp.float32)
        return jnp.maximum(y + b1, 0.0).astype(in_dtype)

    sq_mid = squeeze(x_mid_ref[0].reshape(tH * W, Cin)).reshape(tH, W, c1)
    sq_top = squeeze(x_top_ref[0].reshape(W, Cin)).reshape(1, W, c1)
    sq_bot = squeeze(x_bot_ref[0].reshape(W, Cin)).reshape(1, W, c1)

    # At the image border the halo row is the 3x3 conv's ZERO padding of the
    # squeeze activation (not relu(conv(0))), so zero it explicitly.
    top_scale = jnp.where(s == 0, 0.0, 1.0).astype(in_dtype)
    bot_scale = jnp.where(s == n_strips - 1, 0.0, 1.0).astype(in_dtype)
    sq_top = sq_top * top_scale
    sq_bot = sq_bot * bot_scale

    # (tH+2, W+2, c1): halo rows stacked + zero W padding.
    sq_pad = jnp.pad(jnp.concatenate([sq_top, sq_mid, sq_bot], axis=0),
                     ((0, 0), (1, 1), (0, 0)))

    # dy-concat built ONCE -> (tH, W+2, 3*c1); the 3x3 (+ fused 1x1 expand) is
    # then 3 accumulated matmuls over dx with K = 3*c1.
    q = jnp.concatenate(
        [sq_pad[0:tH], sq_pad[1:tH + 1], sq_pad[2:tH + 2]], axis=-1)

    acc = None
    for dx in range(3):
        slab = q[:, dx:dx + W, :].reshape(tH * W, 3 * c1)
        part = jnp.dot(slab, wcomb_ref[dx], preferred_element_type=jnp.float32)
        acc = part if acc is None else acc + part

    out = jnp.maximum(acc + bcomb_ref[...], 0.0)     # [ea | eb | zero-pad]
    o_ref[0] = out.reshape(tH, W, c_pad).astype(o_ref.dtype)


# --------------------------------------------------------------------------
# wrappers
# --------------------------------------------------------------------------
def fire_pallas_nhwc(x_nhwc, params, *, strip_rows=None,
                     keep_padded_channels=False):
    """Fire forward, NHWC in / NHWC out (production entry point)."""
    w1, b1, w2a, b2a, w2b, b2b = params
    B, H, W, Cin = x_nhwc.shape
    c1 = w1.shape[1]
    c2 = w2a.shape[1]
    c_out = 2 * c2
    c_pad = _choose_c_pad(c_out)
    dtype = x_nhwc.dtype
    itemsize = jnp.dtype(dtype).itemsize

    vmem_limit = _vmem_limit_bytes()
    tH = strip_rows if strip_rows is not None else _choose_strip_rows(
        H, W, Cin, c1, c_pad, itemsize, vmem_limit)
    tH = max(1, min(int(tH), H))
    while H % tH:
        tH -= 1
    n_strips = H // tH

    # Combined expand weight/bias: folds the 1x1 expand, the channel concat
    # and the channel pad into the 3x3 matmul.  Layout: indexed by dx, rows
    # dy*c1:(dy+1)*c1, columns [0:c2]=ea (center tap only), [c2:2c2]=eb.
    w_comb = jnp.zeros((3, 3 * c1, c_pad), dtype)
    for dy in range(3):
        for dx in range(3):
            w_comb = w_comb.at[dx, dy * c1:(dy + 1) * c1, c2:c_out].set(
                w2b[3 * dy + dx].astype(dtype))
    w_comb = w_comb.at[1, c1:2 * c1, 0:c2].set(w2a.astype(dtype))
    b_comb = jnp.zeros((1, c_pad), jnp.float32)
    b_comb = b_comb.at[:, 0:c2].set(b2a.astype(jnp.float32))
    b_comb = b_comb.at[:, c2:c_out].set(b2b.astype(jnp.float32))

    out_padded = pl.pallas_call(
        _fire_kernel,
        out_shape=jax.ShapeDtypeStruct((B, H, W, c_pad), dtype),
        grid_spec=pltpu.PrefetchScalarGridSpec(
            num_scalar_prefetch=0,
            grid=(B, n_strips),
            in_specs=[
                # top halo row (clamped at the border, masked in-kernel)
                pl.BlockSpec((1, 1, W, Cin),
                             lambda b, s: (b, jnp.maximum(s * tH - 1, 0), 0, 0)),
                # the strip itself
                pl.BlockSpec((1, tH, W, Cin), lambda b, s: (b, s, 0, 0)),
                # bottom halo row (clamped at the border, masked in-kernel)
                pl.BlockSpec((1, 1, W, Cin),
                             lambda b, s: (b, jnp.minimum(s * tH + tH, H - 1), 0, 0)),
                # weights / biases: constant index maps -> VMEM-resident,
                # DMA'd once (see TODO about Buffered(1) single-buffering).
                pl.BlockSpec((Cin, c1), lambda b, s: (0, 0)),
                pl.BlockSpec((1, c1), lambda b, s: (0, 0)),
                pl.BlockSpec((3, 3 * c1, c_pad), lambda b, s: (0, 0, 0)),
                pl.BlockSpec((1, c_pad), lambda b, s: (0, 0)),
            ],
            out_specs=pl.BlockSpec((1, tH, W, c_pad),
                                   lambda b, s: (b, s, 0, 0)),
        ),
        compiler_params=pltpu.CompilerParams(
            dimension_semantics=("parallel", "parallel"),
            vmem_limit_bytes=int(vmem_limit)),
    )(x_nhwc, x_nhwc, x_nhwc,
      w1.astype(dtype), b1.astype(jnp.float32), w_comb, b_comb)

    if keep_padded_channels or c_pad == c_out:
        return out_padded
    return out_padded[..., :c_out]


def fire_pallas(x_nchw, params, *, strip_rows=None):
    """NCHW adapter matching the PyTorch module (for testing).

    In a full SqueezeSeg stack keep everything NHWC between Fire modules and
    call fire_pallas_nhwc(..., keep_padded_channels=True) directly; these two
    transposes (and the channel slice) are extra HBM passes that exist only to
    reproduce the PyTorch NCHW interface.
    """
    x_nhwc = jnp.transpose(x_nchw, (0, 2, 3, 1))
    out_nhwc = fire_pallas_nhwc(x_nhwc, params, strip_rows=strip_rows)
    return jnp.transpose(out_nhwc, (0, 3, 1, 2))


# --------------------------------------------------------------------------
# reference & test
# --------------------------------------------------------------------------
def _reference(x_nchw, params):
    """Plain-JAX reference (lax conv) matching PyTorch Fire.forward."""
    w1, b1, w2a, b2a, w2b, b2b = params
    c2 = w2a.shape[1]

    def conv(x, w_oihw, b, pad):
        y = jax.lax.conv_general_dilated(
            x, w_oihw, window_strides=(1, 1), padding=[(pad, pad), (pad, pad)],
            dimension_numbers=("NCHW", "OIHW", "NCHW"))
        return jax.nn.relu(y + b.reshape(1, -1, 1, 1))

    w1_oihw = jnp.transpose(w1, (1, 0))[:, :, None, None]
    w2a_oihw = jnp.transpose(w2a, (1, 0))[:, :, None, None]
    w2b_oihw = jnp.transpose(w2b.reshape(3, 3, w2b.shape[1], c2), (3, 2, 0, 1))

    sq = conv(x_nchw, w1_oihw, b1[0], 0)
    ea = conv(sq, w2a_oihw, b2a[0], 0)
    eb = conv(sq, w2b_oihw, b2b[0], 1)
    return jnp.concatenate([ea, eb], axis=1)


def make_params(key, in_channels, c1, c2):
    k1, k2, k3, k4, k5, k6 = jax.random.split(key, 6)
    scale = 0.1
    w1 = scale * jax.random.normal(k1, (in_channels, c1), jnp.float32)
    b1 = scale * jax.random.normal(k2, (1, c1), jnp.float32)
    w2a = scale * jax.random.normal(k3, (c1, c2), jnp.float32)
    b2a = scale * jax.random.normal(k4, (1, c2), jnp.float32)
    w2b = scale * jax.random.normal(k5, (9, c1, c2), jnp.float32)
    b2b = scale * jax.random.normal(k6, (1, c2), jnp.float32)
    return (w1, b1, w2a, b2a, w2b, b2b)


if __name__ == "__main__":
    B, Cin, H, W = 2, 4, 16, 16
    c1, c2 = 8, 16

    key = jax.random.PRNGKey(0)
    kx, kp = jax.random.split(key)
    x = jax.random.normal(kx, (B, Cin, H, W), jnp.float32)   # NCHW like PyTorch
    params = make_params(kp, Cin, c1, c2)

    ref = _reference(x, params)

    # auto strip size (single strip at this toy size)
    out = jax.block_until_ready(fire_pallas(x, params))
    assert out.shape == (B, 2 * c2, H, W), out.shape
    assert jnp.allclose(out, ref, atol=1e-4, rtol=1e-4), \
        float(jnp.max(jnp.abs(out - ref)))

    # forced multi-strip: exercises the row-strip grid, clamped halo index maps
    # and the border masking.
    out2 = jax.block_until_ready(fire_pallas(x, params, strip_rows=4))
    assert jnp.allclose(out2, ref, atol=1e-4, rtol=1e-4), \
        float(jnp.max(jnp.abs(out2 - ref)))

    # TODO(synk): add a bf16-input tolerance test; intermediates are cast to the
    # input dtype for the MXU, so low-precision inputs need looser tolerances.
    print("KERNEL_OK")
</pallas_src>

<mosaic_0001>
module attributes {stable_mosaic.version = 11 : i64} {
  func.func @_fire_kernel(%arg0: i32, %arg1: i32, %arg2: memref<1x1x16x4xf32, #tpu.memory_space<vmem>>, %arg3: memref<1x16x16x4xf32, #tpu.memory_space<vmem>>, %arg4: memref<1x1x16x4xf32, #tpu.memory_space<vmem>>, %arg5: memref<4x8xf32, #tpu.memory_space<vmem>>, %arg6: memref<1x8xf32, #tpu.memory_space<vmem>>, %arg7: memref<3x24x32xf32, #tpu.memory_space<vmem>>, %arg8: memref<1x32xf32, #tpu.memory_space<vmem>>, %arg9: memref<1x16x16x32xf32, #tpu.memory_space<vmem>>) attributes {dimension_semantics = [#tpu.dimension_semantics<parallel>, #tpu.dimension_semantics<parallel>], iteration_bounds = array<i64: 2, 1>, scalar_prefetch = 0 : i64, scratch_operands = 0 : i64, tpu.core_type = #tpu.core_type<tc>, window_params = [{transform_indices = @transform_0, window_bounds = array<i64: 1, 1, 16, 4>}, {transform_indices = @transform_1, window_bounds = array<i64: 1, 16, 16, 4>}, {transform_indices = @transform_2, window_bounds = array<i64: 1, 1, 16, 4>}, {pipeline_mode = #tpu.pipeline_mode<synchronous>, transform_indices = @transform_3, window_bounds = array<i64: 4, 8>}, {pipeline_mode = #tpu.pipeline_mode<synchronous>, transform_indices = @transform_4, window_bounds = array<i64: 1, 8>}, {pipeline_mode = #tpu.pipeline_mode<synchronous>, transform_indices = @transform_5, window_bounds = array<i64: 3, 24, 32>}, {pipeline_mode = #tpu.pipeline_mode<synchronous>, transform_indices = @transform_6, window_bounds = array<i64: 1, 32>}, {transform_indices = @transform_7, window_bounds = array<i64: 1, 16, 16, 32>}]} {
    %c0 = arith.constant 0 : index
    %c0_0 = arith.constant 0 : index
    %0 = vector.load %arg5[%c0, %c0_0] : memref<4x8xf32, #tpu.memory_space<vmem>>, vector<4x8xf32>
    %c0_1 = arith.constant 0 : index
    %c0_2 = arith.constant 0 : index
    %1 = vector.load %arg6[%c0_1, %c0_2] : memref<1x8xf32, #tpu.memory_space<vmem>>, vector<1x8xf32>
    %c0_3 = arith.constant 0 : index
    %c0_4 = arith.constant 0 : index
    %c0_5 = arith.constant 0 : index
    %c0_6 = arith.constant 0 : index
    %2 = vector.load %arg3[%c0_3, %c0_4, %c0_5, %c0_6] : memref<1x16x16x4xf32, #tpu.memory_space<vmem>>, vector<1x16x16x4xf32>
    %3 = vector.shape_cast %2 : vector<1x16x16x4xf32> to vector<16x16x4xf32>
    %4 = vector.shape_cast %3 : vector<16x16x4xf32> to vector<256x4xf32>
    %cst = arith.constant dense<0.000000e+00> : vector<256x8xf32>
    %5 = tpu.matmul %4, %0, %cst {dimension_numbers = #tpu.dot_dimension_numbers<[1], [0], [0], [1], [0, 0, 1, 1], [], []>} : vector<256x4xf32>, vector<4x8xf32>, vector<256x8xf32> -> vector<256x8xf32>
    %6 = vector.broadcast %1 : vector<1x8xf32> to vector<256x8xf32>
    %7 = arith.addf %5, %6 : vector<256x8xf32>
    %cst_7 = arith.constant 0.000000e+00 : f32
    %8 = vector.broadcast %cst_7 : f32 to vector<256x8xf32>
    %9 = arith.maximumf %7, %8 : vector<256x8xf32>
    %10 = vector.shape_cast %9 : vector<256x8xf32> to vector<16x16x8xf32>
    %c0_8 = arith.constant 0 : index
    %c0_9 = arith.constant 0 : index
    %c0_10 = arith.constant 0 : index
    %c0_11 = arith.constant 0 : index
    %11 = vector.load %arg2[%c0_8, %c0_9, %c0_10, %c0_11] : memref<1x1x16x4xf32, #tpu.memory_space<vmem>>, vector<1x1x16x4xf32>
    %12 = vector.shape_cast %11 : vector<1x1x16x4xf32> to vector<1x16x4xf32>
    %13 = vector.shape_cast %12 : vector<1x16x4xf32> to vector<16x4xf32>
    %cst_12 = arith.constant dense<0.000000e+00> : vector<16x8xf32>
    %14 = tpu.matmul %13, %0, %cst_12 {dimension_numbers = #tpu.dot_dimension_numbers<[1], [0], [0], [1], [0, 0, 1, 1], [], []>} : vector<16x4xf32>, vector<4x8xf32>, vector<16x8xf32> -> vector<16x8xf32>
    %15 = vector.broadcast %1 : vector<1x8xf32> to vector<16x8xf32>
    %16 = arith.addf %14, %15 : vector<16x8xf32>
    %cst_13 = arith.constant 0.000000e+00 : f32
    %17 = vector.broadcast %cst_13 : f32 to vector<16x8xf32>
    %18 = arith.maximumf %16, %17 : vector<16x8xf32>
    %19 = vector.shape_cast %18 : vector<16x8xf32> to vector<1x16x8xf32>
    %c0_14 = arith.constant 0 : index
    %c0_15 = arith.constant 0 : index
    %c0_16 = arith.constant 0 : index
    %c0_17 = arith.constant 0 : index
    %20 = vector.load %arg4[%c0_14, %c0_15, %c0_16, %c0_17] : memref<1x1x16x4xf32, #tpu.memory_space<vmem>>, vector<1x1x16x4xf32>
    %21 = vector.shape_cast %20 : vector<1x1x16x4xf32> to vector<1x16x4xf32>
    %22 = vector.shape_cast %21 : vector<1x16x4xf32> to vector<16x4xf32>
    %cst_18 = arith.constant dense<0.000000e+00> : vector<16x8xf32>
    %23 = tpu.matmul %22, %0, %cst_18 {dimension_numbers = #tpu.dot_dimension_numbers<[1], [0], [0], [1], [0, 0, 1, 1], [], []>} : vector<16x4xf32>, vector<4x8xf32>, vector<16x8xf32> -> vector<16x8xf32>
    %24 = vector.broadcast %1 : vector<1x8xf32> to vector<16x8xf32>
    %25 = arith.addf %23, %24 : vector<16x8xf32>
    %cst_19 = arith.constant 0.000000e+00 : f32
    %26 = vector.broadcast %cst_19 : f32 to vector<16x8xf32>
    %27 = arith.maximumf %25, %26 : vector<16x8xf32>
    %28 = vector.shape_cast %27 : vector<16x8xf32> to vector<1x16x8xf32>
    %c0_i32 = arith.constant 0 : i32
    %29 = arith.cmpi eq, %arg1, %c0_i32 : i32
    %cst_20 = arith.constant 0.000000e+00 : f32
    %cst_21 = arith.constant 1.000000e+00 : f32
    %30 = arith.select %29, %cst_20, %cst_21 : f32
    %c0_i32_22 = arith.constant 0 : i32
    %31 = arith.cmpi eq, %arg1, %c0_i32_22 : i32
    %cst_23 = arith.constant 0.000000e+00 : f32
    %cst_24 = arith.constant 1.000000e+00 : f32
    %32 = arith.select %31, %cst_23, %cst_24 : f32
    %33 = vector.broadcast %30 : f32 to vector<1x16x8xf32>
    %34 = arith.mulf %19, %33 : vector<1x16x8xf32>
    %35 = vector.broadcast %32 : f32 to vector<1x16x8xf32>
    %36 = arith.mulf %28, %35 : vector<1x16x8xf32>
    %37 = tpu.concatenate %34, %10, %36 in 0 : vector<1x16x8xf32>, vector<16x16x8xf32>, vector<1x16x8xf32> -> vector<18x16x8xf32>
    %c0_i32_25 = arith.constant 0 : i32
    %38 = arith.sitofp %c0_i32_25 : i32 to f32
    %39 = vector.broadcast %38 : f32 to vector<18x1x8xf32>
    %40 = tpu.concatenate %39, %37 in 1 : vector<18x1x8xf32>, vector<18x16x8xf32> -> vector<18x17x8xf32>
    %41 = vector.broadcast %38 : f32 to vector<18x1x8xf32>
    %42 = tpu.concatenate %40, %41 in 1 : vector<18x17x8xf32>, vector<18x1x8xf32> -> vector<18x18x8xf32>
    %43 = vector.extract_strided_slice %42 {offsets = [0, 0, 0], sizes = [16, 18, 8], strides = [1, 1, 1]} : vector<18x18x8xf32> to vector<16x18x8xf32>
    %44 = vector.extract_strided_slice %42 {offsets = [1, 0, 0], sizes = [16, 18, 8], strides = [1, 1, 1]} : vector<18x18x8xf32> to vector<16x18x8xf32>
    %45 = vector.extract_strided_slice %42 {offsets = [2, 0, 0], sizes = [16, 18, 8], strides = [1, 1, 1]} : vector<18x18x8xf32> to vector<16x18x8xf32>
    %46 = tpu.concatenate %43, %44, %45 in 2 : vector<16x18x8xf32>, vector<16x18x8xf32>, vector<16x18x8xf32> -> vector<16x18x24xf32>
    %47 = vector.extract_strided_slice %46 {offsets = [0, 0, 0], sizes = [16, 16, 24], strides = [1, 1, 1]} : vector<16x18x24xf32> to vector<16x16x24xf32>
    %48 = vector.shape_cast %47 : vector<16x16x24xf32> to vector<256x24xf32>
    %c0_26 = arith.constant 0 : index
    %c0_27 = arith.constant 0 : index
    %c0_28 = arith.constant 0 : index
    %49 = vector.load %arg7[%c0_26, %c0_27, %c0_28] : memref<3x24x32xf32, #tpu.memory_space<vmem>>, vector<1x24x32xf32>
    %50 = vector.shape_cast %49 : vector<1x24x32xf32> to vector<24x32xf32>
    %cst_29 = arith.constant dense<0.000000e+00> : vector<256x32xf32>
    %51 = tpu.matmul %48, %50, %cst_29 {dimension_numbers = #tpu.dot_dimension_numbers<[1], [0], [0], [1], [0, 0, 1, 1], [], []>} : vector<256x24xf32>, vector<24x32xf32>, vector<256x32xf32> -> vector<256x32xf32>
    %52 = vector.extract_strided_slice %46 {offsets = [0, 1, 0], sizes = [16, 16, 24], strides = [1, 1, 1]} : vector<16x18x24xf32> to vector<16x16x24xf32>
    %53 = vector.shape_cast %52 : vector<16x16x24xf32> to vector<256x24xf32>
    %c1 = arith.constant 1 : index
    %c0_30 = arith.constant 0 : index
    %c0_31 = arith.constant 0 : index
    %54 = vector.load %arg7[%c1, %c0_30, %c0_31] : memref<3x24x32xf32, #tpu.memory_space<vmem>>, vector<1x24x32xf32>
    %55 = vector.shape_cast %54 : vector<1x24x32xf32> to vector<24x32xf32>
    %cst_32 = arith.constant dense<0.000000e+00> : vector<256x32xf32>
    %56 = tpu.matmul %53, %55, %cst_32 {dimension_numbers = #tpu.dot_dimension_numbers<[1], [0], [0], [1], [0, 0, 1, 1], [], []>} : vector<256x24xf32>, vector<24x32xf32>, vector<256x32xf32> -> vector<256x32xf32>
    %57 = arith.addf %51, %56 : vector<256x32xf32>
    %58 = vector.extract_strided_slice %46 {offsets = [0, 2, 0], sizes = [16, 16, 24], strides = [1, 1, 1]} : vector<16x18x24xf32> to vector<16x16x24xf32>
    %59 = vector.shape_cast %58 : vector<16x16x24xf32> to vector<256x24xf32>
    %c2 = arith.constant 2 : index
    %c0_33 = arith.constant 0 : index
    %c0_34 = arith.constant 0 : index
    %60 = vector.load %arg7[%c2, %c0_33, %c0_34] : memref<3x24x32xf32, #tpu.memory_space<vmem>>, vector<1x24x32xf32>
    %61 = vector.shape_cast %60 : vector<1x24x32xf32> to vector<24x32xf32>
    %cst_35 = arith.constant dense<0.000000e+00> : vector<256x32xf32>
    %62 = tpu.matmul %59, %61, %cst_35 {dimension_numbers = #tpu.dot_dimension_numbers<[1], [0], [0], [1], [0, 0, 1, 1], [], []>} : vector<256x24xf32>, vector<24x32xf32>, vector<256x32xf32> -> vector<256x32xf32>
    %63 = arith.addf %57, %62 : vector<256x32xf32>
    %c0_36 = arith.constant 0 : index
    %c0_37 = arith.constant 0 : index
    %64 = vector.load %arg8[%c0_36, %c0_37] : memref<1x32xf32, #tpu.memory_space<vmem>>, vector<1x32xf32>
    %65 = vector.broadcast %64 : vector<1x32xf32> to vector<256x32xf32>
    %66 = arith.addf %63, %65 : vector<256x32xf32>
    %cst_38 = arith.constant 0.000000e+00 : f32
    %67 = vector.broadcast %cst_38 : f32 to vector<256x32xf32>
    %68 = arith.maximumf %66, %67 : vector<256x32xf32>
    %69 = vector.shape_cast %68 : vector<256x32xf32> to vector<16x16x32xf32>
    %c0_39 = arith.constant 0 : index
    %c0_40 = arith.constant 0 : index
    %c0_41 = arith.constant 0 : index
    %c0_42 = arith.constant 0 : index
    %70 = vector.load %arg9[%c0_39, %c0_40, %c0_41, %c0_42] : memref<1x16x16x32xf32, #tpu.memory_space<vmem>>, vector<1x16x16x32xf32>
    %71 = vector.shape_cast %70 : vector<1x16x16x32xf32> to vector<16x16x32xf32>
    %72 = vector.shape_cast %69 : vector<16x16x32xf32> to vector<1x16x16x32xf32>
    tpu.vector_store %arg9[%c0_39, %c0_40, %c0_41, %c0_42], %72 {strides = array<i32>} : memref<1x16x16x32xf32, #tpu.memory_space<vmem>>, vector<1x16x16x32xf32>,
    return
  }
  func.func @transform_0(%arg0: i32, %arg1: i32) -> (i32, i32, i32, i32) {
    %c16_i32 = arith.constant 16 : i32
    %0 = arith.muli %arg1, %c16_i32 : i32
    %c1_i32 = arith.constant 1 : i32
    %1 = arith.subi %0, %c1_i32 : i32
    %c0_i32 = arith.constant 0 : i32
    %2 = arith.maxsi %1, %c0_i32 : i32
    %c0_i32_0 = arith.constant 0 : i32
    %c0_i32_1 = arith.constant 0 : i32
    %c0_i32_2 = arith.constant 0 : i32
    return %arg0, %2, %c0_i32_0, %c0_i32_1 : i32, i32, i32, i32
  }
  func.func @transform_1(%arg0: i32, %arg1: i32) -> (i32, i32, i32, i32) {
    %c0_i32 = arith.constant 0 : i32
    %c0_i32_0 = arith.constant 0 : i32
    %c0_i32_1 = arith.constant 0 : i32
    return %arg0, %arg1, %c0_i32, %c0_i32_0 : i32, i32, i32, i32
  }
  func.func @transform_2(%arg0: i32, %arg1: i32) -> (i32, i32, i32, i32) {
    %c16_i32 = arith.constant 16 : i32
    %0 = arith.muli %arg1, %c16_i32 : i32
    %c16_i32_0 = arith.constant 16 : i32
    %1 = arith.addi %0, %c16_i32_0 : i32
    %c15_i32 = arith.constant 15 : i32
    %2 = arith.minsi %1, %c15_i32 : i32
    %c0_i32 = arith.constant 0 : i32
    %c0_i32_1 = arith.constant 0 : i32
    %c0_i32_2 = arith.constant 0 : i32
    return %arg0, %2, %c0_i32, %c0_i32_1 : i32, i32, i32, i32
  }
  func.func @transform_3(%arg0: i32, %arg1: i32) -> (i32, i32) {
    %c0_i32 = arith.constant 0 : i32
    %c0_i32_0 = arith.constant 0 : i32
    %c0_i32_1 = arith.constant 0 : i32
    return %c0_i32, %c0_i32_0 : i32, i32
  }
  func.func @transform_4(%arg0: i32, %arg1: i32) -> (i32, i32) {
    %c0_i32 = arith.constant 0 : i32
    %c0_i32_0 = arith.constant 0 : i32
    %c0_i32_1 = arith.constant 0 : i32
    return %c0_i32, %c0_i32_0 : i32, i32
  }
  func.func @transform_5(%arg0: i32, %arg1: i32) -> (i32, i32, i32) {
    %c0_i32 = arith.constant 0 : i32
    %c0_i32_0 = arith.constant 0 : i32
    %c0_i32_1 = arith.constant 0 : i32
    %c0_i32_2 = arith.constant 0 : i32
    return %c0_i32, %c0_i32_0, %c0_i32_1 : i32, i32, i32
  }
  func.func @transform_6(%arg0: i32, %arg1: i32) -> (i32, i32) {
    %c0_i32 = arith.constant 0 : i32
    %c0_i32_0 = arith.constant 0 : i32
    %c0_i32_1 = arith.constant 0 : i32
    return %c0_i32, %c0_i32_0 : i32, i32
  }
  func.func @transform_7(%arg0: i32, %arg1: i32) -> (i32, i32, i32, i32) {
    %c0_i32 = arith.constant 0 : i32
    %c0_i32_0 = arith.constant 0 : i32
    %c0_i32_1 = arith.constant 0 : i32
    return %arg0, %arg1, %c0_i32, %c0_i32_0 : i32, i32, i32, i32
  }
}

</mosaic_0001>

<bundles_post_ra>
// kernel: tpu_custom_call.1
= control target key start
LH: loop header
LB: loop body
LE: loop exit
PB: predicated region body
PF: predicated region fallthrough
CT: control target
= control target key end

     0   :  { %12 = vsyncpa [#allocation3], 0  ;;  %s5174_s0 = inlined_call_operand.vmem [shape: f32[2,16,16,4], index: 0, kind: input, shape index: {}]   ;;  %s5175_s1 = inlined_call_operand.vmem [shape: f32[2,16,16,4], index: 1, kind: input, shape index: {}]   ;;  %s5176_s2 = inlined_call_operand.vmem [shape: f32[2,16,16,4], index: 2, kind: input, shape index: {}]   ;;  %s5177_s3 = inlined_call_operand.vmem [shape: f32[4,8], index: 3, kind: input, shape index: {}]   ;;  %s5178_s4 = inlined_call_operand.vmem [shape: f32[1,8], index: 4, kind: input, shape index: {}]   ;;  %s5179_s5 = inlined_call_operand.vmem [shape: f32[3,24,32], index: 5, kind: input, shape index: {}]   ;;  %s5180_s6 = inlined_call_operand.vmem [shape: f32[1,32], index: 6, kind: input, shape index: {}]   ;;  %s5181_s7 = inlined_call_operand.hbm [shape: f32[2,16,16,32], index: 7, kind: output, shape index: {}]  }
   0x1   :  { %14 = vsyncpa [#allocation3 + $0x1], 0  ;;  %s3765_s24 = smov 0   ;;  %s3767_s25 = smov 0  }
   0x2   :  { %s3769_s26 = smov 0   ;;  %s3771_s27 = smov 0  }
   0x3   :  { %s3773_s28 = smov 0   ;;  %s3775_s29 = smov 0  }
   0x4 LB: > { %s2975_s30 = sadd.s32 4294967295, %s3719_s29   ;;  %s2976_s8 = sadd.s32 4294967294, %s3719_s29   ;;  %s3719_s29 = sphi %s3775_s29, %s20_s29   ;;  %s3715_s28 = sphi %s3773_s28, %s5274_s28   ;;  %s3711_s27 = sphi %s3771_s27, %s5273_s27   ;;  %s3707_s26 = sphi %s3769_s26, %s5272_s26   ;;  %s3703_s25 = sphi %s3767_s25, %s5271_s25   ;;  %s3699_s24 = sphi %s3765_s24, %s5270_s24  }
   0x5   : > { %s32_s9 = sadd.s32 1, %s3715_s28  ;;  %s225_s10 = sadd.s32 1, %s3707_s26 }
   0x6   : > { %p34_p0 = scmp.ge.s32.totalorder %s32_s9, 2  ;;  %p235_p1 = scmp.ne.s32.totalorder %s3707_s26, %s3703_s25 }
   0x7   : > { %p236_p2 = scmp.eq.s32.totalorder %s2975_s30, 1  ;;  %p241_p3 = scmp.ne.s32.totalorder %s3703_s25, %s3699_s24 }
   0x8   : > { %s5276_s9 = smov (%p34_p0, %s32_s9), 0  ;;  %p242_p5 = scmp.eq.s32.totalorder %s2976_s8, 1 }
   0x9   : > { %p3805_p4 = por %p236_p2, %p235_p1  ;;  %s220_s12 = ssub.s32 %s3715_s28, %s5276_s9 }
   0xa   : > { %p2979_p6 = scmp.ge.s32.totalorder %s3719_s29, 1  ;;  %p223_p7 = scmp.eq.s32.totalorder %s220_s12, 0 }
   0xb   : > { %p3812_p8 = por %p242_p5, %p241_p3  ;;  %p326_p9 = scmp.lt.s32.totalorder %s3719_s29, 3 }
   0xc   : > { %s3818_s14 = scalar_select %p223_p7, %s3707_s26, %s225_s10  }
   0xd   : > { %p327_p10 = pnand %p2979_p6, %p326_p9 }
   0xf   : > { %330 = sbr.rel (%p327_p10) target bundleno = 792 (0x318), region = 48 }
  0x16   : > { %v435_v0 = vld [vmem:[%s5177_s3] sm:$0xf]  ;;  %vm572_vm0 = vcmask 1043456   ;;  %p393_p11 = scmp.lt.s32.totalorder %s3711_s27, 1  ;;  %vm475_vm1 = vcmask 31744   ;;  %v1610_v38 = vld [vmem:[%s5179_s5 + $0x8] sm:$0xff] }
  0x17   : > { %3285 = vmatprep.subr.msk.mxu0 %vm572_vm0, %v435_v0  ;;  %3340 = vmatprep.subr.msk.mxu1 %vm572_vm0, %v435_v0  ;;  %v1609_v37 = vld [vmem:[%s5179_s5] sm:$0xff]  ;;  %v1611_v48 = vld [vmem:[%s5179_s5 + $0x10] sm:$0xff]  ;;  %vm1046_vm2 = vcmask 1040384   ;;  %s3721_s30 = smov 8   ;;  %vm1511_vm3 = vcmask 64512   ;;  %vm1560_vm4 = vcmask 130048  }
  0x18   : > { %3286 = vmatpush3.msk.msra.mxu0 %vm572_vm0, %v435_v0  ;;  %s394_s17 = scalar_select %p393_p11, %s3711_s27, 1  ;;  %3341 = vmatpush3.msk.msra.mxu1 %vm572_vm0, %v435_v0  ;;  %v3511_v39 = vpack.c.bf16 %v1610_v38, %v1609_v37  ;;  %v3924_v40 = vld [vmem:[%s5178_s4] ss:$0 sm:$0xff]  ;;  %vm1745_vm5 = vcmask 195584   ;;  %vm1660_vm6 = vcmask 1046528   ;;  %vm2324_vm7 = vcmask 1045504  }
  0x19   : > { %3335 = vmatprep.subr.msk.mxu0 %vm572_vm0, %v435_v0  ;;  %vm2801_vm8 = vcmask 261120   ;;  %s3139_s19 = sshll.u32 %s3711_s27, 12  ;;  %s3723_s10 = smov [#allocation2]  }
  0x1a   : > { %s3830_s18 = sshll.u32 %s394_s17, 8  ;;  %3512 = vmatprep.subr.bf16.mxu1 %v3511_v39  ;;  %s3645_s12 = sshll.u32 %s3723_s10, 4  ;;  %s3646_s12 = int_to_ptr.vmem [resolvable:$false] %s3645_s12 }
  0x1b   : > { %s3836_s21 = scalar_lea.vmem %s5175_s1, %s3830_s18  ;;  %s3138_s22 = sadd.s32 240, %s3830_s18 }
  0x1c   : > { %v437_v1 = vld [vmem:[%s3836_s21] sm:$0xff]  ;;  %v438_v2 = vld [vmem:[%s3836_s21 + $0x8] sm:$0xff]  ;;  %v439_v3 = vld [vmem:[%s3836_s21 + $0x10] sm:$0xff]  ;;  %s429_s8 = scalar_lea.vmem %s5176_s2, %s3138_s22  ;;  %s401_s15 = scalar_lea.vmem %s5174_s0, %s3830_s18 }
  0x1d   : > { %3287 = vmatprep.mubr.msk.f32.mxu0 %vm475_vm1, %v437_v1  ;;  %v918_v4 = vld [vmem:[%s429_s8] sm:$0xff]  ;;  %v919_v5 = vld [vmem:[%s429_s8 + $0x8] sm:$0xff]  ;;  %v440_v6 = vld [vmem:[%s3836_s21 + $0x18] sm:$0xff]  ;;  %s3722_s8 = smov 16  }
  0x1e   : > { %3288 = vmatmul.mubr.msk.f32.vlgmr.msra.gmra.mrb[0].mxu0 %vm475_vm1, %v438_v2  ;;  %3342 = vmatprep.mubr.msk.f32.mxu1 %vm475_vm1, %v918_v4  ;;  %v441_v7 = vld [vmem:[%s3836_s21 + $0x20] sm:$0xff]  ;;  %v442_v8 = vld [vmem:[%s3836_s21 + $0x28] sm:$0xff]  ;;  %v443_v9 = vld [vmem:[%s3836_s21 + $0x30] sm:$0xff] }
  0x1f   : > { %3290 = vmatprep.mubr.msk.f32.mxu0 %vm475_vm1, %v439_v3  ;;  %3343 = vmatmul.mubr.msk.f32.vlgmr.msra.gmra.mrb[0].mxu1 %vm475_vm1, %v919_v5  ;;  %v444_v10 = vld [vmem:[%s3836_s21 + $0x38] sm:$0xff]  ;;  %v445_v11 = vld [vmem:[%s3836_s21 + $0x40] sm:$0xff]  ;;  %v446_v12 = vld [vmem:[%s3836_s21 + $0x48] sm:$0xff] }
  0x20   : > { %3336 = vmatpush3.msk.msra.mxu0 %vm572_vm0, %v435_v0  ;;  %v447_v13 = vld [vmem:[%s3836_s21 + $0x50] sm:$0xff]  ;;  %v448_v14 = vld [vmem:[%s3836_s21 + $0x58] sm:$0xff]  ;;  %v449_v15 = vld [vmem:[%s3836_s21 + $0x60] sm:$0xff]  ;;  %3514 = vmatpush3.bf16.msra.mxu1 %v3511_v39 }
  0x21   : > { %v450_v16 = vld [vmem:[%s3836_s21 + $0x68] sm:$0xff]  ;;  %v451_v17 = vld [vmem:[%s3836_s21 + $0x70] sm:$0xff]  ;;  %v452_v18 = vld [vmem:[%s3836_s21 + $0x78] sm:$0xff]  ;;  %3403 = vmatprep.subr.mxu1 %v1611_v48 }
  0x22   : > { %3291 = vmatmul.mubr.msk.f32.gmra.mrb[2].mxu0 %vm475_vm1, %v440_v6  ;;  %v453_v19 = vld [vmem:[%s3836_s21 + $0x80] sm:$0xff]  ;;  %v454_v20 = vld [vmem:[%s3836_s21 + $0x88] sm:$0xff]  ;;  %v455_v21 = vld [vmem:[%s3836_s21 + $0x90] sm:$0xff] }
  0x23   : > { %3293 = vmatprep.mubr.msk.f32.mxu0 %vm475_vm1, %v441_v7  ;;  %v456_v22 = vld [vmem:[%s3836_s21 + $0x98] sm:$0xff]  ;;  %v457_v23 = vld [vmem:[%s3836_s21 + $0xa0] sm:$0xff]  ;;  %v458_v24 = vld [vmem:[%s3836_s21 + $0xa8] sm:$0xff] }
  0x24   : > { %v459_v25 = vld [vmem:[%s3836_s21 + $0xb0] sm:$0xff]  ;;  %v460_v26 = vld [vmem:[%s3836_s21 + $0xb8] sm:$0xff]  ;;  %v461_v27 = vld [vmem:[%s3836_s21 + $0xc0] sm:$0xff]  ;;  %3404 = vmatpush3.msra.mxu1 %v1611_v48 }
  0x25   : > { %v462_v28 = vld [vmem:[%s3836_s21 + $0xc8] sm:$0xff]  ;;  %v463_v29 = vld [vmem:[%s3836_s21 + $0xd0] sm:$0xff]  ;;  %v464_v30 = vld [vmem:[%s3836_s21 + $0xd8] sm:$0xff] }
  0x26   : > { %3294 = vmatmul.mubr.msk.f32.gmra.mrb[4].mxu0 %vm475_vm1, %v442_v8  ;;  %v465_v31 = vld [vmem:[%s3836_s21 + $0xe0] sm:$0xff]  ;;  %v466_v32 = vld [vmem:[%s3836_s21 + $0xe8] sm:$0xff]  ;;  %v467_v33 = vld [vmem:[%s3836_s21 + $0xf0] sm:$0xff] }
  0x27   : > { %3296 = vmatprep.mubr.msk.f32.mxu0 %vm475_vm1, %v443_v9  ;;  %v468_v34 = vld [vmem:[%s3836_s21 + $0xf8] sm:$0xff]  ;;  %v833_v35 = vld [vmem:[%s401_s15] sm:$0xff]  ;;  %v834_v36 = vld [vmem:[%s401_s15 + $0x8] sm:$0xff]  ;;  %s5117_s21 = scalar_lea.hbm %s5181_s7, %s3139_s19  ;;  %s3647_s15 = scalar_lea.vmem %s3646_s12, 8192 }
  0x2a   : > { %3297 = vmatmul.mubr.msk.f32.gmra.mrb[6].mxu0 %vm475_vm1, %v444_v10 }
  0x2b   : > { %3299 = vmatprep.mubr.msk.f32.mxu0 %vm475_vm1, %v445_v11 }
  0x2e   : > { %3300 = vmatmul.mubr.msk.f32.gmra.mrb[8].mxu0 %vm475_vm1, %v446_v12 }
  0x2f   : > { %3302 = vmatprep.mubr.msk.f32.mxu0 %vm475_vm1, %v447_v13 }
  0x32   : > { %3303 = vmatmul.mubr.msk.f32.gmra.mrb[10].mxu0 %vm475_vm1, %v448_v14 }
  0x33   : > { %3305 = vmatprep.mubr.msk.f32.mxu0 %vm475_vm1, %v449_v15 }
  0x36   : > { %3306 = vmatmul.mubr.msk.f32.gmra.mrb[12].mxu0 %vm475_vm1, %v450_v16 }
  0x37   : > { %3308 = vmatprep.mubr.msk.f32.mxu0 %vm475_vm1, %v451_v17 }
  0x3a   : > { %3309 = vmatmul.mubr.msk.f32.gmra.mrb[14].mxu0 %vm475_vm1, %v452_v18 }
  0x3b   : > { %3311 = vmatprep.mubr.msk.f32.mxu0 %vm475_vm1, %v453_v19 }
  0x3e   : > { %3312 = vmatmul.mubr.msk.f32.gmra.mrb[16].mxu0 %vm475_vm1, %v454_v20 }
  0x3f   : > { %3314 = vmatprep.mubr.msk.f32.mxu0 %vm475_vm1, %v455_v21 }
  0x42   : > { %3315 = vmatmul.mubr.msk.f32.gmra.mrb[18].mxu0 %vm475_vm1, %v456_v22 }
  0x43   : > { %3317 = vmatprep.mubr.msk.f32.mxu0 %vm475_vm1, %v457_v23 }
  0x46   : > { %3318 = vmatmul.mubr.msk.f32.gmra.mrb[20].mxu0 %vm475_vm1, %v458_v24 }
  0x47   : > { %3320 = vmatprep.mubr.msk.f32.mxu0 %vm475_vm1, %v459_v25 }
  0x4a   : > { %3321 = vmatmul.mubr.msk.f32.gmra.mrb[22].mxu0 %vm475_vm1, %v460_v26 }
  0x4b   : > { %3323 = vmatprep.mubr.msk.f32.mxu0 %vm475_vm1, %v461_v27 }
  0x4e   : > { %3324 = vmatmul.mubr.msk.f32.gmra.mrb[24].mxu0 %vm475_vm1, %v462_v28 }
  0x4f   : > { %3326 = vmatprep.mubr.msk.f32.mxu0 %vm475_vm1, %v463_v29 }
  0x52   : > { %3327 = vmatmul.mubr.msk.f32.gmra.mrb[26].mxu0 %vm475_vm1, %v464_v30 }
  0x53   : > { %3329 = vmatprep.mubr.msk.f32.mxu0 %vm475_vm1, %v465_v31 }
  0x56   : > { %3330 = vmatmul.mubr.msk.f32.gmra.mrb[28].mxu0 %vm475_vm1, %v466_v32 }
  0x57   : > { %3332 = vmatprep.mubr.msk.f32.mxu0 %vm475_vm1, %v467_v33 }
  0x5a   : > { %3333 = vmatmul.mubr.msk.f32.gmra.mrb[30].mxu0 %vm475_vm1, %v468_v34 }
  0x5b   : > { %3337 = vmatprep.mubr.msk.f32.mxu0 %vm475_vm1, %v833_v35 }
  0x5e   : > { %3338 = vmatmul.mubr.msk.f32.vlgmr.msra.gmra.mrb[32].mxu0 %vm475_vm1, %v834_v36 }
  0xf1   : > { %v3289_v41 = vpop.f32.mrb[0].mxu0 }
  0xf2   : > { %v648_v42 = vadd.f32 %v3289_v41, %v3924_v40  ;;  %v642_v43 = vpop.f32.mrb[1].mxu0  ;;  %v3344_v44 = vpop.f32.mrb[0].mxu1 }
  0xf3   : > { %v643_v45 = vadd.f32 %v3924_v40, %v642_v43  ;;  %v998_v46 = vadd.f32 %v3344_v44, %v3924_v40  ;;  %v992_v47 = vpop.f32.mrb[1].mxu1 }
  0xf4   : > { %v802_v49 = vmax.f32 %v648_v42, 0.0  ;;  %v993_v50 = vadd.f32 %v3924_v40, %v992_v47 }
  0xf5   : > { %v801_v51 = vmax.f32 %v643_v45, 0.0  ;;  %v3292_v52 = vpop.f32.mrb[2].mxu0  ;;  %v1002_v53 = vmax.f32 %v998_v46, 0.0 }
  0xf6   : > { %v1051_v54 = vrot.slane %v802_v49, 7  ;;  %v658_v55 = vadd.f32 %v3292_v52, %v3924_v40  ;;  %v652_v56 = vpop.f32.mrb[3].mxu0  ;;  %v1001_v57 = vmax.f32 %v993_v50, 0.0 }
  0xf7   : > { %v1050_v58 = vrot.slane %v801_v51, 7  ;;  %v653_v59 = vadd.f32 %v3924_v40, %v652_v56  ;;  %v3935_v60 = vmul.f32 0.0, %v1002_v53 }
  0xf8   : > { %v804_v61 = vmax.f32 %v658_v55, 0.0  ;;  %v1008_v62 = vmul.f32 0.0, %v1001_v57  ;;  %v3938_v63 = vsel %vm1046_vm2, %v1051_v54, 0.0 }
  0xf9   : > { %v803_v0 = vmax.f32 %v653_v59, 0.0  ;;  %v5186_v1 = vrot.slane %v3935_v60, 7  ;;  %1225 = vrot.lane.b32.xlu1 %v3938_v63, %s3721_s30  ;;  %v3944_v2 = vsel %vm1046_vm2, 0.0, %v1050_v58  ;;  %v3947_v3 = vsel %vm1046_vm2, %v1050_v58, %v1051_v54  ;;  %v3295_v4 = vpop.f32.mrb[4].mxu0 }
  0xfa   : > { %v3949_v5 = vrot.slane %v804_v61, 7  ;;  %v1098_v6 = vrot.slane %v1008_v62, 7  ;;  %1221 = vrot.lane.b32.xlu0 %v3944_v2, %s3721_s30  ;;  %v668_v7 = vadd.f32 %v3295_v4, %v3924_v40  ;;  %v662_v8 = vpop.f32.mrb[5].mxu0 }
  0xfb   : > { %v1053_v9 = vrot.slane %v803_v0, 7  ;;  %v663_v10 = vadd.f32 %v3924_v40, %v662_v8 }
  0xfc   : > { %v806_v11 = vmax.f32 %v668_v7, 0.0  ;;  %v3958_v12 = vsel %vm1046_vm2, %v1098_v6, %v5186_v1  ;;  %v1170_v21 = vsel %vm1046_vm2, 0.0, %v1098_v6 }
  0xfd   : > { %v3961_v13 = vsel %vm1046_vm2, 0.0, %v1053_v9  ;;  %v805_v14 = vmax.f32 %v663_v10, 0.0  ;;  %v3965_v15 = vsel %vm1046_vm2, %v1053_v9, %v3949_v5  ;;  %v3298_v16 = vpop.f32.mrb[6].mxu0 }
  0xfe   : > { %1367 = vrot.lane.b32.xlu1 %v3961_v13, %s3722_s8  ;;  %1223 = vrot.lane.b32.xlu0 %v3947_v3, %s3721_s30  ;;  %v3971_v17 = vrot.slane %v806_v11, 7  ;;  %v678_v18 = vadd.f32 %v3298_v16, %v3924_v40  ;;  %v672_v19 = vpop.f32.mrb[7].mxu0 }
  0xff   : > { %v1056_v20 = vrot.slane %v805_v14, 7  ;;  %v673_v22 = vadd.f32 %v3924_v40, %v672_v19 }
 0x100   : > { %v808_v23 = vmax.f32 %v678_v18, 0.0 }
 0x101   : > { %v807_v24 = vmax.f32 %v673_v22, 0.0  ;;  %v3978_v25 = vsel %vm1046_vm2, %v1056_v20, %v3971_v17  ;;  %v3301_v26 = vpop.f32.mrb[8].mxu0  ;;  %v3999_v39 = vsel %vm1046_vm2, 0.0, %v1056_v20 }
 0x102   : > { %1369 = vrot.lane.b32.xlu1 %v3965_v15, %s3722_s8  ;;  %1457 = vrot.lane.b32.xlu0 %v1170_v21, %s3722_s8  ;;  %v3983_v27 = vrot.slane %v808_v23, 7  ;;  %v688_v28 = vadd.f32 %v3301_v26, %v3924_v40  ;;  %v682_v29 = vpop.f32.mrb[9].mxu0 }
 0x103   : > { %v1059_v30 = vrot.slane %v807_v24, 7  ;;  %v683_v31 = vadd.f32 %v3924_v40, %v682_v29 }
 0x104   : > { %v810_v32 = vmax.f32 %v688_v28, 0.0 }
 0x105   : > { %v809_v33 = vmax.f32 %v683_v31, 0.0  ;;  %v3989_v34 = vsel %vm1046_vm2, %v1059_v30, %v3983_v27  ;;  %v3304_v35 = vpop.f32.mrb[10].mxu0  ;;  %v4026_v59 = vsel %vm1046_vm2, 0.0, %v1059_v30 }
 0x106   : > { %1229 = vrot.lane.b32.xlu1 %v3965_v15, %s3721_s30  ;;  %1227 = vrot.lane.b32.xlu0 %v3961_v13, %s3721_s30  ;;  %v3995_v36 = vrot.slane %v810_v32, 7  ;;  %v698_v37 = vadd.f32 %v3304_v35, %v3924_v40  ;;  %v692_v38 = vpop.f32.mrb[11].mxu0 }
 0x107   : > { %v1062_v41 = vrot.slane %v809_v33, 7  ;;  %v693_v42 = vadd.f32 %v3924_v40, %v692_v38 }
 0x108   : > { %v812_v43 = vmax.f32 %v698_v37, 0.0 }
 0x109   : > { %v811_v44 = vmax.f32 %v693_v42, 0.0  ;;  %v4004_v45 = vsel %vm1046_vm2, %v1062_v41, %v3995_v36  ;;  %v3307_v46 = vpop.f32.mrb[12].mxu0  ;;  %v4059_v24 = vsel %vm1046_vm2, 0.0, %v1062_v41 }
 0x10a   : > { %1375 = vrot.lane.b32.xlu1 %v3978_v25, %s3722_s8  ;;  %1373 = vrot.lane.b32.xlu0 %v3999_v39, %s3722_s8  ;;  %v4010_v47 = vrot.slane %v812_v43, 7  ;;  %v708_v48 = vadd.f32 %v3307_v46, %v3924_v40  ;;  %v702_v49 = vpop.f32.mrb[13].mxu0 }
 0x10b   : > { %v1065_v50 = vrot.slane %v811_v44, 7  ;;  %v703_v51 = vadd.f32 %v3924_v40, %v702_v49 }
 0x10c   : > { %v814_v52 = vmax.f32 %v708_v48, 0.0 }
 0x10d   : > { %v813_v53 = vmax.f32 %v703_v51, 0.0  ;;  %v4016_v54 = vsel %vm1046_vm2, %v1065_v50, %v4010_v47  ;;  %v3310_v55 = vpop.f32.mrb[14].mxu0 }
 0x10e   : > { %1235 = vrot.lane.b32.xlu1 %v3978_v25, %s3721_s30  ;;  %1233 = vrot.lane.b32.xlu0 %v3999_v39, %s3721_s30  ;;  %v4022_v56 = vrot.slane %v814_v52, 7  ;;  %v718_v57 = vadd.f32 %v3310_v55, %v3924_v40  ;;  %v712_v58 = vpop.f32.mrb[15].mxu0  ;;  %v4092_v52 = vsel %vm1046_vm2, 0.0, %v1065_v50 }
 0x10f   : > { %v4028_v61 = vrot.slane %v813_v53, 7  ;;  %v713_v62 = vadd.f32 %v3924_v40, %v712_v58 }
 0x110   : > { %v816_v0 = vmax.f32 %v718_v57, 0.0 }
 0x111   : > { %v815_v4 = vmax.f32 %v713_v62, 0.0  ;;  %v4034_v6 = vsel %vm1046_vm2, %v4028_v61, %v4022_v56  ;;  %v3313_v7 = vpop.f32.mrb[16].mxu0 }
 0x112   : > { %1381 = vrot.lane.b32.xlu1 %v3989_v34, %s3722_s8  ;;  %1379 = vrot.lane.b32.xlu0 %v4026_v59, %s3722_s8  ;;  %v4040_v8 = vrot.slane %v816_v0, 7  ;;  %v728_v9 = vadd.f32 %v3313_v7, %v3924_v40  ;;  %v722_v10 = vpop.f32.mrb[17].mxu0 }
 0x113   : > { %v4043_v11 = vrot.slane %v815_v4, 7  ;;  %v723_v14 = vadd.f32 %v3924_v40, %v722_v10 }
 0x114   : > { %v818_v16 = vmax.f32 %v728_v9, 0.0 }
 0x115   : > { %v817_v18 = vmax.f32 %v723_v14, 0.0  ;;  %v4049_v19 = vsel %vm1046_vm2, %v4043_v11, %v4040_v8  ;;  %v3316_v20 = vpop.f32.mrb[18].mxu0 }
 0x116   : > { %1241 = vrot.lane.b32.xlu1 %v3989_v34, %s3721_s30  ;;  %1239 = vrot.lane.b32.xlu0 %v4026_v59, %s3721_s30  ;;  %v4055_v21 = vrot.slane %v818_v16, 7  ;;  %v738_v22 = vadd.f32 %v3316_v20, %v3924_v40  ;;  %v732_v23 = vpop.f32.mrb[19].mxu0 }
 0x117   : > { %v4061_v26 = vrot.slane %v817_v18, 7  ;;  %v733_v28 = vadd.f32 %v3924_v40, %v732_v23 }
 0x118   : > { %v820_v29 = vmax.f32 %v738_v22, 0.0 }
 0x119   : > { %v819_v30 = vmax.f32 %v733_v28, 0.0  ;;  %v4067_v31 = vsel %vm1046_vm2, %v4061_v26, %v4055_v21  ;;  %v3319_v32 = vpop.f32.mrb[20].mxu0 }
 0x11a   : > { %1387 = vrot.lane.b32.xlu1 %v4004_v45, %s3722_s8  ;;  %1385 = vrot.lane.b32.xlu0 %v4059_v24, %s3722_s8  ;;  %v4073_v33 = vrot.slane %v820_v29, 7  ;;  %v748_v35 = vadd.f32 %v3319_v32, %v3924_v40  ;;  %v742_v37 = vpop.f32.mrb[21].mxu0  ;;  %v4126_v29 = vsel %vm1046_vm2, 0.0, %v4028_v61 }
 0x11b   : > { %v4076_v38 = vrot.slane %v819_v30, 7  ;;  %v743_v41 = vadd.f32 %v3924_v40, %v742_v37 }
 0x11c   : > { %v822_v42 = vmax.f32 %v748_v35, 0.0 }
 0x11d   : > { %v821_v43 = vmax.f32 %v743_v41, 0.0  ;;  %v4082_v44 = vsel %vm1046_vm2, %v4076_v38, %v4073_v33  ;;  %v3322_v46 = vpop.f32.mrb[22].mxu0 }
 0x11e   : > { %1247 = vrot.lane.b32.xlu1 %v4004_v45, %s3721_s30  ;;  %1245 = vrot.lane.b32.xlu0 %v4059_v24, %s3721_s30  ;;  %v4088_v48 = vrot.slane %v822_v42, 7  ;;  %v758_v49 = vadd.f32 %v3322_v46, %v3924_v40  ;;  %v752_v51 = vpop.f32.mrb[23].mxu0 }
 0x11f   : > { %v4094_v53 = vrot.slane %v821_v43, 7  ;;  %v753_v55 = vadd.f32 %v3924_v40, %v752_v51 }
 0x120   : > { %v824_v57 = vmax.f32 %v758_v49, 0.0 }
 0x121   : > { %v823_v58 = vmax.f32 %v753_v55, 0.0  ;;  %v4100_v62 = vsel %vm1046_vm2, %v4094_v53, %v4088_v48  ;;  %v3325_v0 = vpop.f32.mrb[24].mxu0 }
 0x122   : > { %1393 = vrot.lane.b32.xlu1 %v4016_v54, %s3722_s8  ;;  %1391 = vrot.lane.b32.xlu0 %v4092_v52, %s3722_s8  ;;  %v4106_v50 = vrot.slane %v824_v57, 7  ;;  %v768_v4 = vadd.f32 %v3325_v0, %v3924_v40  ;;  %v762_v7 = vpop.f32.mrb[25].mxu0 }
 0x123   : > { %v4109_v9 = vrot.slane %v823_v58, 7  ;;  %v763_v10 = vadd.f32 %v3924_v40, %v762_v7 }
 0x124   : > { %v826_v14 = vmax.f32 %v768_v4, 0.0 }
 0x125   : > { %v825_v16 = vmax.f32 %v763_v10, 0.0  ;;  %v4115_v18 = vsel %vm1046_vm2, %v4109_v9, %v4106_v50  ;;  %v3328_v20 = vpop.f32.mrb[26].mxu0 }
 0x126   : > { %1253 = vrot.lane.b32.xlu1 %v4016_v54, %s3721_s30  ;;  %1251 = vrot.lane.b32.xlu0 %v4092_v52, %s3721_s30  ;;  %v4121_v22 = vrot.slane %v826_v14, 7  ;;  %v778_v23 = vadd.f32 %v3328_v20, %v3924_v40  ;;  %v772_v28 = vpop.f32.mrb[27].mxu0  ;;  %v4160_v14 = vsel %vm1046_vm2, 0.0, %v4043_v11 }
 0x127   : > { %v4128_v30 = vrot.slane %v825_v16, 7  ;;  %v773_v32 = vadd.f32 %v3924_v40, %v772_v28 }
 0x128   : > { %v828_v35 = vmax.f32 %v778_v23, 0.0 }
 0x129   : > { %v827_v37 = vmax.f32 %v773_v32, 0.0  ;;  %v4134_v41 = vsel %vm1046_vm2, %v4128_v30, %v4121_v22  ;;  %v3331_v42 = vpop.f32.mrb[28].mxu0 }
 0x12a   : > { %1399 = vrot.lane.b32.xlu1 %v4034_v6, %s3722_s8  ;;  %1397 = vrot.lane.b32.xlu0 %v4126_v29, %s3722_s8  ;;  %v4140_v61 = vrot.slane %v828_v35, 7  ;;  %v788_v43 = vadd.f32 %v3331_v42, %v3924_v40  ;;  %v782_v46 = vpop.f32.mrb[29].mxu0  ;;  %v3095_v42 = vld [vmem:[%s5179_s5 + $0x38] sm:$0xff] }
 0x12b   : > { %v4143_v49 = vrot.slane %v827_v37, 7  ;;  %v783_v51 = vadd.f32 %v3924_v40, %v782_v46  ;;  %v3094_v37 = vld [vmem:[%s5179_s5 + $0x30] sm:$0xff] }
 0x12c   : > { %v830_v55 = vmax.f32 %v788_v43, 0.0 }
 0x12d   : > { %v829_v57 = vmax.f32 %v783_v51, 0.0  ;;  %v3334_v58 = vpop.f32.mrb[30].mxu0  ;;  %v4149_v0 = vsel %vm1046_vm2, %v4143_v49, %v4140_v61  ;;  %v4180_v51 = vpack.c.bf16 %v3095_v42, %v3094_v37  ;;  %v4219_v42 = vsel %vm1046_vm2, 0.0, %v4094_v53 }
 0x12e   : > { %1259 = vrot.lane.b32.xlu1 %v4034_v6, %s3721_s30  ;;  %1257 = vrot.lane.b32.xlu0 %v4126_v29, %s3721_s30  ;;  %v4155_v4 = vrot.slane %v830_v55, 7  ;;  %v798_v7 = vadd.f32 %v3334_v58, %v3924_v40  ;;  %v792_v10 = vpop.f32.mrb[31].mxu0  ;;  %v4243_v53 = vsel %vm1046_vm2, 0.0, %v4128_v30 }
 0x12f   : > { %v1092_v16 = vrot.slane %v829_v57, 7  ;;  %v793_v20 = vadd.f32 %v3924_v40, %v792_v10  ;;  %3516 = vmatprep.subr.bf16.mxu1 %v4180_v51 }
 0x130   : > { %v832_v23 = vmax.f32 %v798_v7, 0.0 }
 0x131   : > { %v831_v28 = vmax.f32 %v793_v20, 0.0  ;;  %v3339_v32 = vpop.f32.mrb[32].mxu0  ;;  %v4165_v35 = vsel %vm1046_vm2, %v1092_v16, %v4155_v4  ;;  %v4266_v30 = vsel %vm1046_vm2, 0.0, %v1092_v16 }
 0x132   : > { %1405 = vrot.lane.b32.xlu1 %v4049_v19, %s3722_s8  ;;  %1403 = vrot.lane.b32.xlu0 %v4160_v14, %s3722_s8  ;;  %v4177_v11 = vrot.slane %v832_v23, 7  ;;  %v913_v43 = vadd.f32 %v3339_v32, %v3924_v40  ;;  %v907_v46 = vpop.f32.mrb[33].mxu0  ;;  %v4194_v23 = vsel %vm1046_vm2, 0.0, %v4061_v26  ;;  %v4207_v26 = vsel %vm1046_vm2, 0.0, %v4076_v38 }
 0x133   : > { %v1095_v55 = vrot.slane %v831_v28, 7  ;;  %v908_v57 = vadd.f32 %v3924_v40, %v907_v46  ;;  %v4231_v38 = vsel %vm1046_vm2, 0.0, %v4109_v9  ;;  %v4255_v9 = vsel %vm1046_vm2, 0.0, %v4143_v49  ;;  %v3027_v49 = vld [vmem:[%s5179_s5 + $0x18] sm:$0xff]  ;;  %v3028_v46 = vld [vmem:[%s5179_s5 + $0x20] sm:$0xff] }
 0x134   : > { %v917_v58 = vmax.f32 %v913_v43, 0.0 }
 0x135   : > { %v916_v7 = vmax.f32 %v908_v57, 0.0  ;;  %v4186_v10 = vsel %vm1046_vm2, %v1095_v55, %v4177_v11  ;;  %v3507_v57 = vpack.c.bf16 %v3028_v46, %v3027_v49 }
 0x136   : > { %1265 = vrot.lane.b32.xlu1 %v4049_v19, %s3721_s30  ;;  %1263 = vrot.lane.b32.xlu0 %v4160_v14, %s3721_s30  ;;  %v1007_v20 = vmul.f32 0.0, %v917_v58 }
 0x137   : > { %v1006_v40 = vmul.f32 0.0, %v916_v7  ;;  %3508 = vmatprep.subr.bf16.mxu0 %v3507_v57 }
 0x138   : > { %v1048_v28 = vrot.slane %v1007_v20, 7  ;;  %3510 = vmatpush3.bf16.msra.mxu0 %v3507_v57 }
 0x139   : > { %v1047_v32 = vrot.slane %v1006_v40, 7  ;;  %v1169_v40 = vsel %vm1046_vm2, 0.0, %v1095_v55 }
 0x13a   : > { %1411 = vrot.lane.b32.xlu1 %v4067_v31, %s3722_s8  ;;  %1409 = vrot.lane.b32.xlu0 %v4194_v23, %s3722_s8  ;;  %v1171_v43 = vsel %vm1046_vm2, %v1048_v28, 0.0 }
 0x13b   : > { %v1049_v37 = vsel %vm1046_vm2, %v1047_v32, %v1048_v28  ;;  %v1153_v20 = vsel %vm1046_vm2, 0.0, %v1047_v32  ;;  %v3029_v28 = vld [vmem:[%s5179_s5 + $0x28] sm:$0xff] }
 0x13c   : > { %3349 = vmatprep.subr.mxu0 %v3029_v28 }
 0x13d   : > { %3350 = vmatpush3.msra.mxu0 %v3029_v28 }
 0x13e   : > { %1271 = vrot.lane.b32.xlu1 %v4067_v31, %s3721_s30  ;;  %1269 = vrot.lane.b32.xlu0 %v4194_v23, %s3721_s30 }
 0x142   : > { %1417 = vrot.lane.b32.xlu1 %v4082_v44, %s3722_s8  ;;  %1415 = vrot.lane.b32.xlu0 %v4207_v26, %s3722_s8 }
 0x146   : > { %1277 = vrot.lane.b32.xlu1 %v4082_v44, %s3721_s30  ;;  %1275 = vrot.lane.b32.xlu0 %v4207_v26, %s3721_s30 }
 0x14a   : > { %1423 = vrot.lane.b32.xlu1 %v4100_v62, %s3722_s8  ;;  %1421 = vrot.lane.b32.xlu0 %v4219_v42, %s3722_s8 }
 0x14e   : > { %1283 = vrot.lane.b32.xlu1 %v4100_v62, %s3721_s30  ;;  %1281 = vrot.lane.b32.xlu0 %v4219_v42, %s3721_s30 }
 0x152   : > { %1429 = vrot.lane.b32.xlu1 %v4115_v18, %s3722_s8  ;;  %1427 = vrot.lane.b32.xlu0 %v4231_v38, %s3722_s8 }
 0x156   : > { %1289 = vrot.lane.b32.xlu1 %v4115_v18, %s3721_s30  ;;  %1287 = vrot.lane.b32.xlu0 %v4231_v38, %s3721_s30 }
 0x15a   : > { %1435 = vrot.lane.b32.xlu1 %v4134_v41, %s3722_s8  ;;  %1433 = vrot.lane.b32.xlu0 %v4243_v53, %s3722_s8 }
 0x15e   : > { %1295 = vrot.lane.b32.xlu1 %v4134_v41, %s3721_s30  ;;  %1293 = vrot.lane.b32.xlu0 %v4243_v53, %s3721_s30 }
 0x162   : > { %1441 = vrot.lane.b32.xlu1 %v4149_v0, %s3722_s8  ;;  %1439 = vrot.lane.b32.xlu0 %v4255_v9, %s3722_s8 }
 0x166   : > { %1301 = vrot.lane.b32.xlu1 %v4149_v0, %s3721_s30  ;;  %1299 = vrot.lane.b32.xlu0 %v4255_v9, %s3721_s30 }
 0x16a   : > { %1447 = vrot.lane.b32.xlu1 %v4165_v35, %s3722_s8  ;;  %1445 = vrot.lane.b32.xlu0 %v4266_v30, %s3722_s8 }
 0x16b   : > { %v1226_v16 = vpop.permute.xlu1 %1225 }
 0x16c   : > { %v4280_v58 = vsel %vm1511_vm3, %v1171_v43, %v1226_v16  ;;  %v1222_v7 = vpop.permute.xlu0 %1221 }
 0x16d   : > { %v1512_v43 = vsel %vm1511_vm3, %v1153_v20, %v1222_v7 }
 0x16e   : > { %1307 = vrot.lane.b32.xlu1 %v4165_v35, %s3721_s30  ;;  %1305 = vrot.lane.b32.xlu0 %v4266_v30, %s3721_s30 }
 0x170   : > { %v1368_v49 = vpop.permute.xlu1 %1367  ;;  %v1224_v46 = vpop.permute.xlu0 %1223 }
 0x171   : > { %v1561_v32 = vsel %vm1560_vm4, %v1512_v43, %v1368_v49  ;;  %v1513_v55 = vsel %vm1511_vm3, %v1049_v37, %v1224_v46  ;;  %v3096_v37 = vld [vmem:[%s5179_s5 + $0x40] sm:$0xff] }
 0x172   : > { %1453 = vrot.lane.b32.xlu1 %v4186_v10, %s3722_s8  ;;  %1451 = vrot.lane.b32.xlu0 %v1169_v40, %s3722_s8  ;;  %v1661_v20 = vrot.slane %v1561_v32, 1  ;;  %v2325_v43 = vrot.slane %v1561_v32, 2 }
 0x173   : > { %3405 = vmatprep.mubr.msk.f32.mxu1 %vm1745_vm5, %v1561_v32 }
 0x174   : > { %v1370_v57 = vpop.permute.xlu1 %1369  ;;  %v4298_v16 = vpop.permute.xlu0 %1457 }
 0x175   : > { %v4301_v7 = vsel %vm1560_vm4, %v1513_v55, %v1370_v57 }
 0x176   : > { %v5182_v28 = vrot.slane %v4301_v7, 1  ;;  %v5183_v49 = vrot.slane %v4301_v7, 2  ;;  %1313 = vrot.lane.b32.xlu1 %v4186_v10, %s3721_s30  ;;  %1311 = vrot.lane.b32.xlu0 %v1169_v40, %s3721_s30  ;;  %v4325_v40 = vsel %vm1046_vm2, %v3949_v5, 0.0 }
 0x177   : > { %3406 = vmatmul.mubr.msk.f32.vlgmr.msra.gmra.mrb[2].mxu1 %vm1745_vm5, %v4301_v7 }
 0x178   : > { %v1230_v46 = vpop.permute.xlu1 %1229  ;;  %v1228_v55 = vpop.permute.xlu0 %1227  ;;  %v1663_v32 = vsel %vm1660_vm6, %v1661_v20, %v5182_v28  ;;  %3518 = vmatpush3.bf16.msra.mxu1 %v4180_v51  ;;  %v4320_v10 = vsel %vm2324_vm7, %v2325_v43, %v5183_v49  ;;  %v4341_v28 = vsel %vm1046_vm2, %v3971_v17, 0.0 }
 0x179   : > { %3351 = vmatprep.mubr.msk.f32.mxu0 %vm1745_vm5, %v1663_v32  ;;  %3457 = vmatprep.subr.mxu1 %v3096_v37  ;;  %v1516_v51 = vsel %vm1511_vm3, %v3947_v3, %v1230_v46  ;;  %v1515_v57 = vsel %vm1511_vm3, %v3944_v2, %v1228_v55 }
 0x17a   : > { %1371 = vrot.lane.b32.xlu1 %v4325_v40, %s3722_s8  ;;  %1459 = vrot.lane.b32.xlu0 %v3958_v12, %s3722_s8 }
 0x17c   : > { %v1376_v20 = vpop.permute.xlu1 %1375  ;;  %v1374_v43 = vpop.permute.xlu0 %1373  ;;  %3458 = vmatpush3.msra.mxu1 %v3096_v37 }
 0x17d   : > { %v4336_v32 = vsel %vm1560_vm4, %v1516_v51, %v1376_v20  ;;  %v1564_v5 = vsel %vm1560_vm4, %v1515_v57, %v1374_v43  ;;  %v4364_v51 = vsel %vm1046_vm2, %v3983_v27, 0.0 }
 0x17e   : > { %v5185_v12 = vrot.slane %v4336_v32, 1  ;;  %v5184_v49 = vrot.slane %v4336_v32, 2  ;;  %v1666_v3 = vrot.slane %v1564_v5, 1  ;;  %v2330_v46 = vrot.slane %v1564_v5, 2  ;;  %1377 = vrot.lane.b32.xlu1 %v4341_v28, %s3722_s8  ;;  %1231 = vrot.lane.b32.xlu0 %v4325_v40, %s3721_s30 }
 0x17f   : > { %3408 = vmatprep.mubr.msk.f32.mxu1 %vm1745_vm5, %v1564_v5 }
 0x180   : > { %3409 = vmatmul.mubr.msk.f32.gmra.mrb[4].mxu1 %vm1745_vm5, %v4336_v32  ;;  %v1236_v2 = vpop.permute.xlu1 %1235  ;;  %v1234_v17 = vpop.permute.xlu0 %1233  ;;  %v4355_v37 = vsel %vm1660_vm6, %v1666_v3, %v5185_v12  ;;  %v4360_v55 = vsel %vm2324_vm7, %v2330_v46, %v5184_v49  ;;  %v4380_v46 = vsel %vm1046_vm2, %v3995_v36, 0.0 }
 0x181   : > { %v1519_v57 = vsel %vm1511_vm3, %v3965_v15, %v1236_v2  ;;  %v1518_v20 = vsel %vm1511_vm3, %v3961_v13, %v1234_v17  ;;  %5223 = vst [vmem:[#allocation5_spill] sm:$0xff] %v4380_v46 }
 0x182   : > { %1383 = vrot.lane.b32.xlu1 %v4364_v51, %s3722_s8  ;;  %1237 = vrot.lane.b32.xlu0 %v4341_v28, %s3721_s30 }
 0x184   : > { %v1382_v43 = vpop.permute.xlu1 %1381  ;;  %v1380_v5 = vpop.permute.xlu0 %1379 }
 0x185   : > { %v4375_v3 = vsel %vm1560_vm4, %v1519_v57, %v1382_v43  ;;  %v1567_v27 = vsel %vm1560_vm4, %v1518_v20, %v1380_v5  ;;  %v4403_v57 = vsel %vm1046_vm2, %v4010_v47, 0.0 }
 0x186   : > { %v5188_v49 = vrot.slane %v4375_v3, 1  ;;  %v5187_v12 = vrot.slane %v4375_v3, 2  ;;  %v1671_v1 = vrot.slane %v1567_v27, 1  ;;  %v2335_v15 = vrot.slane %v1567_v27, 2  ;;  %1389 = vrot.lane.b32.xlu1 %v4380_v46, %s3722_s8  ;;  %1243 = vrot.lane.b32.xlu0 %v4364_v51, %s3721_s30 }
 0x187   : > { %3411 = vmatprep.mubr.msk.f32.mxu1 %vm1745_vm5, %v1567_v27 }
 0x188   : > { %3412 = vmatmul.mubr.msk.f32.gmra.mrb[6].mxu1 %vm1745_vm5, %v4375_v3  ;;  %v1242_v13 = vpop.permute.xlu1 %1241  ;;  %v1240_v36 = vpop.permute.xlu0 %1239  ;;  %v4394_v2 = vsel %vm1660_vm6, %v1671_v1, %v5188_v49  ;;  %v4399_v17 = vsel %vm2324_vm7, %v2335_v15, %v5187_v12  ;;  %v4419_v15 = vsel %vm1046_vm2, %v4022_v56, 0.0 }
 0x189   : > { %v1522_v20 = vsel %vm1511_vm3, %v3978_v25, %v1242_v13  ;;  %v1521_v1 = vsel %vm1511_vm3, %v3999_v39, %v1240_v36  ;;  %5224 = vst [vmem:[#allocation6_spill] sm:$0xff] %v4419_v15 }
 0x18a   : > { %1395 = vrot.lane.b32.xlu1 %v4403_v57, %s3722_s8  ;;  %1249 = vrot.lane.b32.xlu0 %v4380_v46, %s3721_s30 }
 0x18c   : > { %v1388_v43 = vpop.permute.xlu1 %1387  ;;  %v1386_v5 = vpop.permute.xlu0 %1385 }
 0x18d   : > { %v4414_v27 = vsel %vm1560_vm4, %v1522_v20, %v1388_v43  ;;  %v1570_v47 = vsel %vm1560_vm4, %v1521_v1, %v1386_v5  ;;  %v4442_v20 = vsel %vm1046_vm2, %v4040_v8, 0.0 }
 0x18e   : > { %v5191_v12 = vrot.slane %v4414_v27, 1  ;;  %v5190_v49 = vrot.slane %v4414_v27, 2  ;;  %v1676_v46 = vrot.slane %v1570_v47, 1  ;;  %v2340_v25 = vrot.slane %v1570_v47, 2  ;;  %1401 = vrot.lane.b32.xlu1 %v4419_v15, %s3722_s8  ;;  %1255 = vrot.lane.b32.xlu0 %v4403_v57, %s3721_s30 }
 0x18f   : > { %3414 = vmatprep.mubr.msk.f32.mxu1 %vm1745_vm5, %v1570_v47 }
 0x190   : > { %3415 = vmatmul.mubr.msk.f32.gmra.mrb[8].mxu1 %vm1745_vm5, %v4414_v27  ;;  %v1248_v39 = vpop.permute.xlu1 %1247  ;;  %v1246_v56 = vpop.permute.xlu0 %1245  ;;  %v4433_v13 = vsel %vm1660_vm6, %v1676_v46, %v5191_v12  ;;  %v4438_v36 = vsel %vm2324_vm7, %v2340_v25, %v5190_v49  ;;  %v4458_v25 = vsel %vm1046_vm2, %v4055_v21, 0.0 }
 0x191   : > { %v1525_v1 = vsel %vm1511_vm3, %v3989_v34, %v1248_v39  ;;  %v1524_v46 = vsel %vm1511_vm3, %v4026_v59, %v1246_v56  ;;  %5225 = vst [vmem:[#allocation7_spill] sm:$0xff] %v4458_v25 }
 0x192   : > { %1407 = vrot.lane.b32.xlu1 %v4442_v20, %s3722_s8  ;;  %1261 = vrot.lane.b32.xlu0 %v4419_v15, %s3721_s30 }
 0x194   : > { %v1394_v43 = vpop.permute.xlu1 %1393  ;;  %v1392_v5 = vpop.permute.xlu0 %1391 }
 0x195   : > { %v4453_v47 = vsel %vm1560_vm4, %v1525_v1, %v1394_v43  ;;  %v1573_v8 = vsel %vm1560_vm4, %v1524_v46, %v1392_v5  ;;  %v4481_v1 = vsel %vm1046_vm2, %v4073_v33, 0.0 }
 0x196   : > { %v5194_v49 = vrot.slane %v4453_v47, 1  ;;  %v5193_v12 = vrot.slane %v4453_v47, 2  ;;  %v1681_v15 = vrot.slane %v1573_v8, 1  ;;  %v2345_v34 = vrot.slane %v1573_v8, 2  ;;  %1413 = vrot.lane.b32.xlu1 %v4458_v25, %s3722_s8  ;;  %1267 = vrot.lane.b32.xlu0 %v4442_v20, %s3721_s30 }
 0x197   : > { %3417 = vmatprep.mubr.msk.f32.mxu1 %vm1745_vm5, %v1573_v8 }
 0x198   : > { %3418 = vmatmul.mubr.msk.f32.gmra.mrb[10].mxu1 %vm1745_vm5, %v4453_v47  ;;  %v1254_v59 = vpop.permute.xlu1 %1253  ;;  %v1252_v21 = vpop.permute.xlu0 %1251  ;;  %v4472_v39 = vsel %vm1660_vm6, %v1681_v15, %v5194_v49  ;;  %v4477_v56 = vsel %vm2324_vm7, %v2345_v34, %v5193_v12  ;;  %v4497_v34 = vsel %vm1046_vm2, %v4088_v48, 0.0 }
 0x199   : > { %v1528_v46 = vsel %vm1511_vm3, %v4004_v45, %v1254_v59  ;;  %v1527_v15 = vsel %vm1511_vm3, %v4059_v24, %v1252_v21  ;;  %5226 = vst [vmem:[#allocation8_spill] sm:$0xff] %v4497_v34 }
 0x19a   : > { %1419 = vrot.lane.b32.xlu1 %v4481_v1, %s3722_s8  ;;  %1273 = vrot.lane.b32.xlu0 %v4458_v25, %s3721_s30 }
 0x19c   : > { %v1400_v43 = vpop.permute.xlu1 %1399  ;;  %v1398_v5 = vpop.permute.xlu0 %1397 }
 0x19d   : > { %v4492_v8 = vsel %vm1560_vm4, %v1528_v46, %v1400_v43  ;;  %v1576_v33 = vsel %vm1560_vm4, %v1527_v15, %v1398_v5  ;;  %v4520_v46 = vsel %vm1046_vm2, %v4106_v50, 0.0 }
 0x19e   : > { %v5197_v12 = vrot.slane %v4492_v8, 1  ;;  %v5196_v49 = vrot.slane %v4492_v8, 2  ;;  %v1686_v25 = vrot.slane %v1576_v33, 1  ;;  %v2350_v45 = vrot.slane %v1576_v33, 2  ;;  %1425 = vrot.lane.b32.xlu1 %v4497_v34, %s3722_s8  ;;  %1279 = vrot.lane.b32.xlu0 %v4481_v1, %s3721_s30  ;;  %5227 = vst [vmem:[#allocation9_spill] sm:$0xff] %v4520_v46 }
 0x19f   : > { %3420 = vmatprep.mubr.msk.f32.mxu1 %vm1745_vm5, %v1576_v33 }
 0x1a0   : > { %3421 = vmatmul.mubr.msk.f32.gmra.mrb[12].mxu1 %vm1745_vm5, %v4492_v8  ;;  %v1260_v24 = vpop.permute.xlu1 %1259  ;;  %v1258_v48 = vpop.permute.xlu0 %1257  ;;  %v4511_v59 = vsel %vm1660_vm6, %v1686_v25, %v5197_v12  ;;  %v4516_v21 = vsel %vm2324_vm7, %v2350_v45, %v5196_v49  ;;  %v4536_v45 = vsel %vm1046_vm2, %v4121_v22, 0.0 }
 0x1a1   : > { %v1531_v15 = vsel %vm1511_vm3, %v4016_v54, %v1260_v24  ;;  %v1530_v25 = vsel %vm1511_vm3, %v4092_v52, %v1258_v48  ;;  %5228 = vst [vmem:[#allocation10_spill] sm:$0xff] %v4536_v45 }
 0x1a2   : > { %1431 = vrot.lane.b32.xlu1 %v4520_v46, %s3722_s8  ;;  %1285 = vrot.lane.b32.xlu0 %v4497_v34, %s3721_s30 }
 0x1a4   : > { %v1406_v43 = vpop.permute.xlu1 %1405  ;;  %v1404_v5 = vpop.permute.xlu0 %1403 }
 0x1a5   : > { %v4531_v33 = vsel %vm1560_vm4, %v1531_v15, %v1406_v43  ;;  %v1579_v50 = vsel %vm1560_vm4, %v1530_v25, %v1404_v5  ;;  %v4559_v15 = vsel %vm1046_vm2, %v4140_v61, 0.0 }
 0x1a6   : > { %v5200_v49 = vrot.slane %v4531_v33, 1  ;;  %v5199_v12 = vrot.slane %v4531_v33, 2  ;;  %v1691_v34 = vrot.slane %v1579_v50, 1  ;;  %v2355_v54 = vrot.slane %v1579_v50, 2  ;;  %1437 = vrot.lane.b32.xlu1 %v4536_v45, %s3722_s8  ;;  %1291 = vrot.lane.b32.xlu0 %v4520_v46, %s3721_s30  ;;  %5229 = vst [vmem:[#allocation11_spill] sm:$0xff] %v4559_v15 }
 0x1a7   : > { %3423 = vmatprep.mubr.msk.f32.mxu1 %vm1745_vm5, %v1579_v50 }
 0x1a8   : > { %3424 = vmatmul.mubr.msk.f32.gmra.mrb[14].mxu1 %vm1745_vm5, %v4531_v33  ;;  %v1266_v52 = vpop.permute.xlu1 %1265  ;;  %v1264_v22 = vpop.permute.xlu0 %1263  ;;  %v4550_v24 = vsel %vm1660_vm6, %v1691_v34, %v5200_v49  ;;  %v4555_v48 = vsel %vm2324_vm7, %v2355_v54, %v5199_v12  ;;  %v4575_v54 = vsel %vm1046_vm2, %v4155_v4, 0.0 }
 0x1a9   : > { %v1534_v25 = vsel %vm1511_vm3, %v4034_v6, %v1266_v52  ;;  %v1533_v34 = vsel %vm1511_vm3, %v4126_v29, %v1264_v22  ;;  %5230 = vst [vmem:[#allocation12_spill] sm:$0xff] %v4575_v54 }
 0x1aa   : > { %1443 = vrot.lane.b32.xlu1 %v4559_v15, %s3722_s8  ;;  %1297 = vrot.lane.b32.xlu0 %v4536_v45, %s3721_s30 }
 0x1ac   : > { %v1412_v43 = vpop.permute.xlu1 %1411  ;;  %v1410_v5 = vpop.permute.xlu0 %1409 }
 0x1ad   : > { %v4570_v50 = vsel %vm1560_vm4, %v1534_v25, %v1412_v43  ;;  %v1582_v61 = vsel %vm1560_vm4, %v1533_v34, %v1410_v5  ;;  %v1187_v25 = vsel %vm1046_vm2, %v4177_v11, 0.0  ;;  %v5231_v11 = vrot.slane %v3935_v60, 7 }
 0x1ae   : > { %v5203_v12 = vrot.slane %v4570_v50, 1  ;;  %v5202_v49 = vrot.slane %v4570_v50, 2  ;;  %v1696_v45 = vrot.slane %v1582_v61, 1  ;;  %v2360_v6 = vrot.slane %v1582_v61, 2  ;;  %1449 = vrot.lane.b32.xlu1 %v4575_v54, %s3722_s8  ;;  %1303 = vrot.lane.b32.xlu0 %v4559_v15, %s3721_s30 }
 0x1af   : > { %3426 = vmatprep.mubr.msk.f32.mxu1 %vm1745_vm5, %v1582_v61 }
 0x1b0   : > { %3427 = vmatmul.mubr.msk.f32.gmra.mrb[16].mxu1 %vm1745_vm5, %v4570_v50  ;;  %v1272_v29 = vpop.permute.xlu1 %1271  ;;  %v1270_v4 = vpop.permute.xlu0 %1269  ;;  %v4589_v52 = vsel %vm1660_vm6, %v1696_v45, %v5203_v12  ;;  %v4594_v22 = vsel %vm2324_vm7, %v2360_v6, %v5202_v49  ;;  %v1188_v49 = vsel %vm1046_vm2, %v5231_v11, 0.0 }
 0x1b1   : > { %v1537_v34 = vsel %vm1511_vm3, %v4049_v19, %v1272_v29  ;;  %v1536_v45 = vsel %vm1511_vm3, %v4160_v14, %v1270_v4 }
 0x1b2   : > { %1455 = vrot.lane.b32.xlu1 %v1187_v25, %s3722_s8  ;;  %1309 = vrot.lane.b32.xlu0 %v4575_v54, %s3721_s30 }
 0x1b4   : > { %v1418_v43 = vpop.permute.xlu1 %1417  ;;  %v1416_v5 = vpop.permute.xlu0 %1415 }
 0x1b5   : > { %v4606_v61 = vsel %vm1560_vm4, %v1537_v34, %v1418_v43  ;;  %v1585_v6 = vsel %vm1560_vm4, %v1536_v45, %v1416_v5 }
 0x1b6   : > { %v5208_v12 = vrot.slane %v4606_v61, 1  ;;  %v5206_v54 = vrot.slane %v4606_v61, 2  ;;  %v1701_v15 = vrot.slane %v1585_v6, 1  ;;  %v2365_v19 = vrot.slane %v1585_v6, 2  ;;  %1461 = vrot.lane.b32.xlu1 %v1188_v49, %s3722_s8  ;;  %1315 = vrot.lane.b32.xlu0 %v1187_v25, %s3721_s30  ;;  %s386_s8 = sand.u32 1, %s3703_s25  }
 0x1b7   : > { %3429 = vmatprep.mubr.msk.f32.mxu1 %vm1745_vm5, %v1585_v6  ;;  %s2980_s16 = sshll.u32 %s386_s8, 8  ;;  %s5127_s27 = scalar_lea.sflag [#allocation3], %s386_s8 }
 0x1b8   : > { %3430 = vmatmul.mubr.msk.f32.gmra.mrb[18].mxu1 %vm1745_vm5, %v4606_v61  ;;  %v1278_v14 = vpop.permute.xlu1 %1277  ;;  %v1276_v29 = vpop.permute.xlu0 %1275  ;;  %v4622_v60 = vsel %vm1660_vm6, %v1701_v15, %v5208_v12  ;;  %v4627_v4 = vsel %vm2324_vm7, %v2365_v19, %v5206_v54  ;;  %s5020_s17 = scalar_lea.vmem [#allocation2], %s2980_s16 }
 0x1b9   : > { %v1540_v49 = vsel %vm1511_vm3, %v4067_v31, %v1278_v14  ;;  %v1539_v25 = vsel %vm1511_vm3, %v4194_v23, %v1276_v29  ;;  %s2851_s20 = sshll.u32 %s5020_s17, 4  ;;  %s5119_s20 = int_to_ptr.vmem [resolvable:$true] %s2851_s20 }
 0x1ba   : > { %s3641_s23 = scalar_lea.vmem %s5119_s20, 4096  ;;  %p3648_p1 = scmp.lt.s32.totalorder %s5119_s20, %s3646_s12 }
 0x1bb   : > { %p3642_p12 = scmp.ne.s32.totalorder %s5119_s20, %s3641_s23  ;;  %p3649_p2 = scmp.lt.s32.totalorder %s3647_s15, %s3641_s23 }
 0x1bc   : > { %v1424_v34 = vpop.permute.xlu1 %1423  ;;  %v1422_v45 = vpop.permute.xlu0 %1421 }
 0x1bd   : > { %v4634_v43 = vsel %vm1560_vm4, %v1540_v49, %v1424_v34  ;;  %v1588_v5 = vsel %vm1560_vm4, %v1539_v25, %v1422_v45  ;;  %p3643_p13 = pnand %p3642_p12, %p3805_p4  ;;  %p3650_p3 = por %p3649_p2, %p3648_p1 }
 0x1be   : > { %v5207_v15 = vrot.slane %v4634_v43, 1  ;;  %v5209_v6 = vrot.slane %v4634_v43, 2  ;;  %v1706_v11 = vrot.slane %v1588_v5, 1  ;;  %v2370_v19 = vrot.slane %v1588_v5, 2  ;;  %3432 = vmatprep.mubr.msk.f32.mxu1 %vm1745_vm5, %v1588_v5 }
 0x1bf   : > { %3433 = vmatmul.mubr.msk.f32.gmra.mrb[20].mxu1 %vm1745_vm5, %v4634_v43  ;;  %p3644_p0 = pneg %p3643_p13 }
 0x1c0   : > { %v1284_v31 = vpop.permute.xlu1 %1283  ;;  %v1282_v23 = vpop.permute.xlu0 %1281  ;;  %v4645_v14 = vsel %vm1660_vm6, %v1706_v11, %v5207_v15  ;;  %v4650_v29 = vsel %vm2324_vm7, %v2370_v19, %v5209_v6 }
 0x1c1   : > { %v1543_v49 = vsel %vm1511_vm3, %v4082_v44, %v1284_v31  ;;  %v1542_v25 = vsel %vm1511_vm3, %v4207_v26, %v1282_v23  ;;  %p3651_p5 = pnand %p3650_p3, %p3644_p0 }
 0x1c4   : > { %v1430_v34 = vpop.permute.xlu1 %1429  ;;  %v1428_v45 = vpop.permute.xlu0 %1427 }
 0x1c5   : > { %v4657_v5 = vsel %vm1560_vm4, %v1543_v49, %v1430_v34  ;;  %v1591_v54 = vsel %vm1560_vm4, %v1542_v25, %v1428_v45 }
 0x1c6   : > { %v5210_v11 = vrot.slane %v4657_v5, 1  ;;  %v5212_v15 = vrot.slane %v4657_v5, 2  ;;  %v1711_v12 = vrot.slane %v1591_v54, 1  ;;  %v2375_v19 = vrot.slane %v1591_v54, 2  ;;  %3435 = vmatprep.mubr.msk.f32.mxu1 %vm1745_vm5, %v1591_v54 }
 0x1c7   : > { %3436 = vmatmul.mubr.msk.f32.gmra.mrb[22].mxu1 %vm1745_vm5, %v4657_v5 }
 0x1c8   : > { %v1290_v44 = vpop.permute.xlu1 %1289  ;;  %v1288_v26 = vpop.permute.xlu0 %1287  ;;  %v4668_v31 = vsel %vm1660_vm6, %v1711_v12, %v5210_v11  ;;  %v4673_v23 = vsel %vm2324_vm7, %v2375_v19, %v5212_v15 }
 0x1c9   : > { %v1546_v49 = vsel %vm1511_vm3, %v4100_v62, %v1290_v44  ;;  %v1545_v54 = vsel %vm1511_vm3, %v4219_v42, %v1288_v26 }
 0x1cc   : > { %v1436_v25 = vpop.permute.xlu1 %1435  ;;  %v1434_v34 = vpop.permute.xlu0 %1433 }
 0x1cd   : > { %v4680_v45 = vsel %vm1560_vm4, %v1546_v49, %v1436_v25  ;;  %v1594_v6 = vsel %vm1560_vm4, %v1545_v54, %v1434_v34 }
 0x1ce   : > { %5232 = vst [vmem:[#allocation13_spill] sm:$0xff] %v4680_v45  ;;  %v5213_v12 = vrot.slane %v4680_v45, 1  ;;  %v5216_v11 = vrot.slane %v4680_v45, 2  ;;  %v1716_v46 = vrot.slane %v1594_v6, 1  ;;  %v2380_v19 = vrot.slane %v1594_v6, 2  ;;  %3438 = vmatprep.mubr.msk.f32.mxu1 %vm1745_vm5, %v1594_v6 }
 0x1cf   : > { %3439 = vmatmul.mubr.msk.f32.gmra.mrb[24].mxu1 %vm1745_vm5, %v4680_v45 }
 0x1d0   : > { %v1296_v62 = vpop.permute.xlu1 %1295  ;;  %v1294_v42 = vpop.permute.xlu0 %1293  ;;  %v4691_v44 = vsel %vm1660_vm6, %v1716_v46, %v5213_v12  ;;  %v4696_v26 = vsel %vm2324_vm7, %v2380_v19, %v5216_v11 }
 0x1d1   : > { %v1549_v49 = vsel %vm1511_vm3, %v4115_v18, %v1296_v62  ;;  %v1548_v6 = vsel %vm1511_vm3, %v4231_v38, %v1294_v42 }
 0x1d4   : > { %v1442_v54 = vpop.permute.xlu1 %1441  ;;  %v1440_v25 = vpop.permute.xlu0 %1439 }
 0x1d5   : > { %v4703_v34 = vsel %vm1560_vm4, %v1549_v49, %v1442_v54  ;;  %v1597_v15 = vsel %vm1560_vm4, %v1548_v6, %v1440_v25 }
 0x1d6   : > { %5233 = vst [vmem:[#allocation14_spill] sm:$0xff] %v4703_v34  ;;  %v5217_v46 = vrot.slane %v4703_v34, 1  ;;  %v5220_v12 = vrot.slane %v4703_v34, 2  ;;  %v1721_v45 = vrot.slane %v1597_v15, 1  ;;  %v2385_v19 = vrot.slane %v1597_v15, 2  ;;  %3441 = vmatprep.mubr.msk.f32.mxu1 %vm1745_vm5, %v1597_v15 }
 0x1d7   : > { %3442 = vmatmul.mubr.msk.f32.gmra.mrb[26].mxu1 %vm1745_vm5, %v4703_v34 }
 0x1d8   : > { %v1302_v18 = vpop.permute.xlu1 %1301  ;;  %v1300_v38 = vpop.permute.xlu0 %1299  ;;  %v4714_v62 = vsel %vm1660_vm6, %v1721_v45, %v5217_v46  ;;  %v4719_v42 = vsel %vm2324_vm7, %v2385_v19, %v5220_v12 }
 0x1d9   : > { %v1552_v49 = vsel %vm1511_vm3, %v4134_v41, %v1302_v18  ;;  %v1551_v15 = vsel %vm1511_vm3, %v4243_v53, %v1300_v38 }
 0x1dc   : > { %v1448_v6 = vpop.permute.xlu1 %1447  ;;  %v1446_v54 = vpop.permute.xlu0 %1445 }
 0x1dd   : > { %v4726_v25 = vsel %vm1560_vm4, %v1552_v49, %v1448_v6  ;;  %v1600_v11 = vsel %vm1560_vm4, %v1551_v15, %v1446_v54 }
 0x1de   : > { %v1727_v45 = vrot.slane %v4726_v25, 1  ;;  %v2391_v46 = vrot.slane %v4726_v25, 2  ;;  %v1726_v34 = vrot.slane %v1600_v11, 1  ;;  %v2390_v19 = vrot.slane %v1600_v11, 2  ;;  %3444 = vmatprep.mubr.msk.f32.mxu1 %vm1745_vm5, %v1600_v11 }
 0x1df   : > { %3445 = vmatmul.mubr.msk.f32.gmra.mrb[28].mxu1 %vm1745_vm5, %v4726_v25 }
 0x1e0   : > { %v1308_v41 = vpop.permute.xlu1 %1307  ;;  %v1306_v53 = vpop.permute.xlu0 %1305  ;;  %v4737_v18 = vsel %vm1660_vm6, %v1726_v34, %v1727_v45  ;;  %v4742_v38 = vsel %vm2324_vm7, %v2390_v19, %v2391_v46 }
 0x1e1   : > { %v1555_v49 = vsel %vm1511_vm3, %v4149_v0, %v1308_v41  ;;  %v1554_v11 = vsel %vm1511_vm3, %v4255_v9, %v1306_v53 }
 0x1e4   : > { %v1454_v15 = vpop.permute.xlu1 %1453  ;;  %v1452_v6 = vpop.permute.xlu0 %1451 }
 0x1e5   : > { %v4749_v54 = vsel %vm1560_vm4, %v1555_v49, %v1454_v15  ;;  %v4752_v12 = vsel %vm1560_vm4, %v1554_v11, %v1452_v6 }
 0x1e6   : > { %3447 = vmatprep.mubr.msk.f32.mxu1 %vm1745_vm5, %v4752_v12 }
 0x1e7   : > { %3448 = vmatmul.mubr.msk.f32.gmra.mrb[30].mxu1 %vm1745_vm5, %v4749_v54 }
 0x1e8   : > { %v1314_v34 = vpop.permute.xlu1 %1313  ;;  %v1312_v19 = vpop.permute.xlu0 %1311 }
 0x1e9   : > { %v1557_v0 = vsel %vm1511_vm3, %v4266_v30, %v1312_v19  ;;  %v1558_v41 = vsel %vm1511_vm3, %v4165_v35, %v1314_v34 }
 0x1ea   : > { %v4762_v9 = vsel %vm1560_vm4, %v1557_v0, %v4298_v16  ;;  %v5234_v16 = vrot.slane %v4301_v7, 2  ;;  %v5235_v0 = vrot.slane %v4301_v7, 1 }
 0x1eb   : > { %3450 = vmatprep.mubr.msk.f32.mxu1 %vm1745_vm5, %v4762_v9  ;;  %v2400_v25 = vrot.slane %v4762_v9, 2 }
 0x1ec   : > { %v1372_v53 = vpop.permute.xlu1 %1371  ;;  %v1460_v49 = vpop.permute.xlu0 %1459 }
 0x1ed   : > { %v1563_v11 = vsel %vm1560_vm4, %v4280_v58, %v1372_v53  ;;  %v4771_v15 = vsel %vm1560_vm4, %v1558_v41, %v1460_v49 }
 0x1ee   : > { %v1664_v6 = vrot.slane %v1563_v11, 1  ;;  %v2328_v30 = vrot.slane %v1563_v11, 2  ;;  %3451 = vmatmul.mubr.msk.f32.gmra.mrb[32].mxu1 %vm1745_vm5, %v4771_v15 }
 0x1ef   : > { %3459 = vmatprep.mubr.msk.f32.mxu1 %vm1745_vm5, %v4320_v10 }
 0x1f0   : > { %v2329_v35 = vsel %vm2324_vm7, %v5234_v16, %v2328_v30  ;;  %v1378_v34 = vpop.permute.xlu1 %1377  ;;  %v1232_v19 = vpop.permute.xlu0 %1231  ;;  %v1665_v58 = vsel %vm1660_vm6, %v5235_v0, %v1664_v6  ;;  %v5237_v16 = vrot.slane %v4336_v32, 2  ;;  %v5238_v0 = vrot.slane %v4375_v3, 1 }
 0x1f1   : > { %v1517_v41 = vsel %vm1511_vm3, %v3938_v63, %v1232_v19  ;;  %3352 = vmatmul.mubr.msk.f32.vlgmr.msra.gmra.mrb[34].mxu0 %vm1745_vm5, %v1665_v58  ;;  %v5236_v63 = vrot.slane %v4336_v32, 1 }
 0x1f2   : > { %v1566_v53 = vsel %vm1560_vm4, %v1517_v41, %v1378_v34  ;;  %3354 = vmatprep.mubr.msk.f32.mxu0 %vm1745_vm5, %v4355_v37  ;;  %3460 = vmatmul.mubr.msk.f32.vlgmr.msra.gmra.mrb[2].mxu1 %vm1745_vm5, %v2329_v35  ;;  %v5239_v41 = vrot.slane %v4375_v3, 2 }
 0x1f3   : > { %v1669_v10 = vrot.slane %v1566_v53, 1  ;;  %v2333_v49 = vrot.slane %v1566_v53, 2  ;;  %3462 = vmatprep.mubr.msk.f32.mxu1 %vm1745_vm5, %v4360_v55 }
 0x1f4   : > { %v1384_v7 = vpop.permute.xlu1 %1383  ;;  %v1238_v11 = vpop.permute.xlu0 %1237 }
 0x1f5   : > { %v1520_v6 = vsel %vm1511_vm3, %v4325_v40, %v1238_v11  ;;  %v1670_v30 = vsel %vm1660_vm6, %v5236_v63, %v1669_v10  ;;  %v2334_v37 = vsel %vm2324_vm7, %v5237_v16, %v2333_v49 }
 0x1f6   : > { %v1569_v35 = vsel %vm1560_vm4, %v1520_v6, %v1384_v7  ;;  %3355 = vmatmul.mubr.msk.f32.gmra.mrb[36].mxu0 %vm1745_vm5, %v1670_v30  ;;  %3463 = vmatmul.mubr.msk.f32.gmra.mrb[4].mxu1 %vm1745_vm5, %v2334_v37  ;;  %v5240_v7 = vrot.slane %v4414_v27, 1  ;;  %v5241_v6 = vrot.slane %v4414_v27, 2  ;;  %v5242_v37 = vld [vmem:[#allocation5_spill] sm:$0xff] }
 0x1f7   : > { %v1674_v55 = vrot.slane %v1569_v35, 1  ;;  %v2338_v34 = vrot.slane %v1569_v35, 2  ;;  %3357 = vmatprep.mubr.msk.f32.mxu0 %vm1745_vm5, %v4394_v2  ;;  %3465 = vmatprep.mubr.msk.f32.mxu1 %vm1745_vm5, %v4399_v17  ;;  %v5243_v35 = vrot.slane %v4453_v47, 1 }
 0x1f8   : > { %v1390_v40 = vpop.permute.xlu1 %1389  ;;  %v1244_v19 = vpop.permute.xlu0 %1243 }
 0x1f9   : > { %v1523_v32 = vsel %vm1511_vm3, %v4341_v28, %v1244_v19  ;;  %v1675_v58 = vsel %vm1660_vm6, %v5238_v0, %v1674_v55  ;;  %v2339_v53 = vsel %vm2324_vm7, %v5239_v41, %v2338_v34  ;;  %v5244_v34 = vrot.slane %v4453_v47, 2 }
 0x1fa   : > { %v1572_v10 = vsel %vm1560_vm4, %v1523_v32, %v1390_v40  ;;  %3358 = vmatmul.mubr.msk.f32.gmra.mrb[38].mxu0 %vm1745_vm5, %v1675_v58  ;;  %3466 = vmatmul.mubr.msk.f32.gmra.mrb[6].mxu1 %vm1745_vm5, %v2339_v53  ;;  %v5245_v58 = vrot.slane %v4492_v8, 1  ;;  %v5246_v53 = vrot.slane %v4492_v8, 2 }
 0x1fb   : > { %v1679_v2 = vrot.slane %v1572_v10, 1  ;;  %v2343_v17 = vrot.slane %v1572_v10, 2  ;;  %3360 = vmatprep.mubr.msk.f32.mxu0 %vm1745_vm5, %v4433_v13  ;;  %3468 = vmatprep.mubr.msk.f32.mxu1 %vm1745_vm5, %v4438_v36 }
 0x1fc   : > { %v1396_v28 = vpop.permute.xlu1 %1395  ;;  %v1250_v49 = vpop.permute.xlu0 %1249 }
 0x1fd   : > { %v1526_v3 = vsel %vm1511_vm3, %v4364_v51, %v1250_v49  ;;  %v1680_v11 = vsel %vm1660_vm6, %v5240_v7, %v1679_v2  ;;  %v2344_v63 = vsel %vm2324_vm7, %v5241_v6, %v2343_v17  ;;  %v5248_v49 = vrot.slane %v4531_v33, 1 }
 0x1fe   : > { %v1575_v30 = vsel %vm1560_vm4, %v1526_v3, %v1396_v28  ;;  %3361 = vmatmul.mubr.msk.f32.gmra.mrb[40].mxu0 %vm1745_vm5, %v1680_v11  ;;  %3469 = vmatmul.mubr.msk.f32.gmra.mrb[8].mxu1 %vm1745_vm5, %v2344_v63  ;;  %v5247_v28 = vld [vmem:[#allocation6_spill] sm:$0xff]  ;;  %v5249_v7 = vrot.slane %v4531_v33, 2 }
 0x1ff   : > { %v1684_v13 = vrot.slane %v1575_v30, 1  ;;  %v2348_v36 = vrot.slane %v1575_v30, 2  ;;  %3363 = vmatprep.mubr.msk.f32.mxu0 %vm1745_vm5, %v4472_v39  ;;  %3471 = vmatprep.mubr.msk.f32.mxu1 %vm1745_vm5, %v4477_v56 }
 0x200   : > { %v1402_v51 = vpop.permute.xlu1 %1401  ;;  %v1256_v16 = vpop.permute.xlu0 %1255 }
 0x201   : > { %v1529_v27 = vsel %vm1511_vm3, %v5242_v37, %v1256_v16  ;;  %v1685_v55 = vsel %vm1660_vm6, %v5243_v35, %v1684_v13  ;;  %v2349_v40 = vsel %vm2324_vm7, %v5244_v34, %v2348_v36  ;;  %v5250_v13 = vrot.slane %v4570_v50, 1  ;;  %v5252_v35 = vld [vmem:[#allocation7_spill] sm:$0xff] }
 0x202   : > { %v1578_v19 = vsel %vm1560_vm4, %v1529_v27, %v1402_v51  ;;  %3364 = vmatmul.mubr.msk.f32.gmra.mrb[42].mxu0 %vm1745_vm5, %v1685_v55  ;;  %3472 = vmatmul.mubr.msk.f32.gmra.mrb[10].mxu1 %vm1745_vm5, %v2349_v40  ;;  %v5251_v51 = vrot.slane %v4570_v50, 2  ;;  %v5253_v55 = vrot.slane %v4606_v61, 1  ;;  %v5254_v40 = vrot.slane %v4606_v61, 2 }
 0x203   : > { %v1689_v39 = vrot.slane %v1578_v19, 1  ;;  %v2353_v56 = vrot.slane %v1578_v19, 2  ;;  %3366 = vmatprep.mubr.msk.f32.mxu0 %vm1745_vm5, %v4511_v59  ;;  %3474 = vmatprep.mubr.msk.f32.mxu1 %vm1745_vm5, %v4516_v21 }
 0x204   : > { %v1408_v32 = vpop.permute.xlu1 %1407  ;;  %v1262_v0 = vpop.permute.xlu0 %1261 }
 0x205   : > { %v1532_v47 = vsel %vm1511_vm3, %v4403_v57, %v1262_v0  ;;  %v1690_v41 = vsel %vm1660_vm6, %v5245_v58, %v1689_v39  ;;  %v2354_v10 = vsel %vm2324_vm7, %v5246_v53, %v2353_v56  ;;  %v5255_v0 = vrot.slane %v4634_v43, 1 }
 0x206   : > { %v1581_v2 = vsel %vm1560_vm4, %v1532_v47, %v1408_v32  ;;  %3367 = vmatmul.mubr.msk.f32.gmra.mrb[44].mxu0 %vm1745_vm5, %v1690_v41  ;;  %3475 = vmatmul.mubr.msk.f32.gmra.mrb[12].mxu1 %vm1745_vm5, %v2354_v10  ;;  %v5256_v58 = vrot.slane %v4634_v43, 2 }
 0x207   : > { %v1694_v59 = vrot.slane %v1581_v2, 1  ;;  %v2358_v21 = vrot.slane %v1581_v2, 2  ;;  %3369 = vmatprep.mubr.msk.f32.mxu0 %vm1745_vm5, %v4550_v24  ;;  %3477 = vmatprep.mubr.msk.f32.mxu1 %vm1745_vm5, %v4555_v48  ;;  %v5257_v2 = vld [vmem:[#allocation8_spill] sm:$0xff] }
 0x208   : > { %v1414_v57 = vpop.permute.xlu1 %1413  ;;  %v1268_v17 = vpop.permute.xlu0 %1267 }
 0x209   : > { %v1535_v8 = vsel %vm1511_vm3, %v5247_v28, %v1268_v17  ;;  %v1695_v3 = vsel %vm1660_vm6, %v5248_v49, %v1694_v59  ;;  %v2359_v11 = vsel %vm2324_vm7, %v5249_v7, %v2358_v21  ;;  %v5258_v59 = vrot.slane %v4657_v5, 1  ;;  %v5261_v7 = vld [vmem:[#allocation13_spill] sm:$0xff] }
 0x20a   : > { %v1584_v6 = vsel %vm1560_vm4, %v1535_v8, %v1414_v57  ;;  %3370 = vmatmul.mubr.msk.f32.gmra.mrb[46].mxu0 %vm1745_vm5, %v1695_v3  ;;  %3478 = vmatmul.mubr.msk.f32.gmra.mrb[14].mxu1 %vm1745_vm5, %v2359_v11  ;;  %v5259_v57 = vrot.slane %v4657_v5, 2  ;;  %v5260_v3 = vld [vmem:[#allocation9_spill] sm:$0xff]  ;;  %v5262_v11 = vrot.slane %v5261_v7, 1 }
 0x20b   : > { %v1699_v24 = vrot.slane %v1584_v6, 1  ;;  %v2363_v48 = vrot.slane %v1584_v6, 2  ;;  %3372 = vmatprep.mubr.msk.f32.mxu0 %vm1745_vm5, %v4589_v52  ;;  %3480 = vmatprep.mubr.msk.f32.mxu1 %vm1745_vm5, %v4594_v22 }
 0x20c   : > { %v1420_v63 = vpop.permute.xlu1 %1419  ;;  %v1274_v30 = vpop.permute.xlu0 %1273 }
 0x20d   : > { %v1538_v33 = vsel %vm1511_vm3, %v4442_v20, %v1274_v30  ;;  %v1700_v36 = vsel %vm1660_vm6, %v5250_v13, %v1699_v24  ;;  %v2364_v16 = vsel %vm2324_vm7, %v5251_v51, %v2363_v48  ;;  %v5263_v24 = vrot.slane %v5261_v7, 2  ;;  %v5264_v51 = vld [vmem:[#allocation10_spill] sm:$0xff] }
 0x20e   : > { %v1587_v37 = vsel %vm1560_vm4, %v1538_v33, %v1420_v63  ;;  %3373 = vmatmul.mubr.msk.f32.gmra.mrb[48].mxu0 %vm1745_vm5, %v1700_v36  ;;  %3481 = vmatmul.mubr.msk.f32.gmra.mrb[16].mxu1 %vm1745_vm5, %v2364_v16  ;;  %v1732_v30 = vrot.slane %v4749_v54, 1  ;;  %v1731_v36 = vrot.slane %v4752_v12, 1 }
 0x20f   : > { %v1704_v52 = vrot.slane %v1587_v37, 1  ;;  %v2368_v22 = vrot.slane %v1587_v37, 2  ;;  %3375 = vmatprep.mubr.msk.f32.mxu0 %vm1745_vm5, %v4622_v60  ;;  %3483 = vmatprep.mubr.msk.f32.mxu1 %vm1745_vm5, %v4627_v4  ;;  %v5265_v37 = vld [vmem:[#allocation14_spill] sm:$0xff] }
 0x210   : > { %v1426_v20 = vpop.permute.xlu1 %1425  ;;  %v1280_v27 = vpop.permute.xlu0 %1279 }
 0x211   : > { %v1541_v50 = vsel %vm1511_vm3, %v5252_v35, %v1280_v27  ;;  %v1705_v34 = vsel %vm1660_vm6, %v5253_v55, %v1704_v52  ;;  %v2369_v19 = vsel %vm2324_vm7, %v5254_v40, %v2368_v22  ;;  %v5266_v52 = vrot.slane %v5265_v37, 1 }
 0x212   : > { %v1590_v39 = vsel %vm1560_vm4, %v1541_v50, %v1426_v20  ;;  %3376 = vmatmul.mubr.msk.f32.gmra.mrb[50].mxu0 %vm1745_vm5, %v1705_v34  ;;  %3484 = vmatmul.mubr.msk.f32.gmra.mrb[18].mxu1 %vm1745_vm5, %v2369_v19  ;;  %v5267_v20 = vrot.slane %v5265_v37, 2  ;;  %v2396_v27 = vrot.slane %v4749_v54, 2  ;;  %v5268_v19 = vld [vmem:[#allocation11_spill] sm:$0xff] }
 0x213   : > { %v1709_v60 = vrot.slane %v1590_v39, 1  ;;  %v2373_v4 = vrot.slane %v1590_v39, 2  ;;  %3378 = vmatprep.mubr.msk.f32.mxu0 %vm1745_vm5, %v4645_v14  ;;  %3486 = vmatprep.mubr.msk.f32.mxu1 %vm1745_vm5, %v4650_v29 }
 0x214   : > { %v1432_v56 = vpop.permute.xlu1 %1431  ;;  %v1286_v32 = vpop.permute.xlu0 %1285 }
 0x215   : > { %v1544_v61 = vsel %vm1511_vm3, %v4481_v1, %v1286_v32  ;;  %v1710_v47 = vsel %vm1660_vm6, %v5255_v0, %v1709_v60  ;;  %v2374_v41 = vsel %vm2324_vm7, %v5256_v58, %v2373_v4  ;;  %v1733_v60 = vsel %vm1660_vm6, %v1731_v36, %v1732_v30  ;;  %v5269_v0 = vld [vmem:[#allocation12_spill] sm:$0xff] }
 0x216   : > { %v1593_v53 = vsel %vm1560_vm4, %v1544_v61, %v1432_v56  ;;  %3379 = vmatmul.mubr.msk.f32.gmra.mrb[52].mxu0 %vm1745_vm5, %v1710_v47  ;;  %3487 = vmatmul.mubr.msk.f32.gmra.mrb[20].mxu1 %vm1745_vm5, %v2374_v41  ;;  %v2401_v4 = vrot.slane %v4771_v15, 2 }
 0x217   : > { %v1714_v14 = vrot.slane %v1593_v53, 1  ;;  %v2378_v29 = vrot.slane %v1593_v53, 2  ;;  %3381 = vmatprep.mubr.msk.f32.mxu0 %vm1745_vm5, %v4668_v31  ;;  %3489 = vmatprep.mubr.msk.f32.mxu1 %vm1745_vm5, %v4673_v23 }
 0x218   : > { %v1438_v1 = vpop.permute.xlu1 %1437  ;;  %v1292_v10 = vpop.permute.xlu0 %1291 }
 0x219   : > { %v1547_v43 = vsel %vm1511_vm3, %v5257_v2, %v1292_v10  ;;  %v1715_v21 = vsel %vm1660_vm6, %v5258_v59, %v1714_v14  ;;  %v2379_v17 = vsel %vm2324_vm7, %v5259_v57, %v2378_v29  ;;  %v5014_v57 = vld [vmem:[%s5180_s6] ss:$0 sm:$0xff] }
 0x21a   : > { %v1596_v28 = vsel %vm1560_vm4, %v1547_v43, %v1438_v1  ;;  %3382 = vmatmul.mubr.msk.f32.gmra.mrb[54].mxu0 %vm1745_vm5, %v1715_v21  ;;  %3490 = vmatmul.mubr.msk.f32.gmra.mrb[22].mxu1 %vm1745_vm5, %v2379_v17 }
 0x21b   : > { %v1719_v31 = vrot.slane %v1596_v28, 1  ;;  %v2383_v23 = vrot.slane %v1596_v28, 2  ;;  %3384 = vmatprep.mubr.msk.f32.mxu0 %vm1745_vm5, %v4691_v44  ;;  %3492 = vmatprep.mubr.msk.f32.mxu1 %vm1745_vm5, %v4696_v26 }
 0x21c   : > { %v1444_v8 = vpop.permute.xlu1 %1443  ;;  %v1298_v49 = vpop.permute.xlu0 %1297 }
 0x21d   : > { %v1550_v5 = vsel %vm1511_vm3, %v5260_v3, %v1298_v49  ;;  %v1720_v6 = vsel %vm1660_vm6, %v5262_v11, %v1719_v31  ;;  %v2384_v48 = vsel %vm2324_vm7, %v5263_v24, %v2383_v23 }
 0x21e   : > { %v1599_v63 = vsel %vm1560_vm4, %v1550_v5, %v1444_v8  ;;  %3385 = vmatmul.mubr.msk.f32.gmra.mrb[56].mxu0 %vm1745_vm5, %v1720_v6  ;;  %3493 = vmatmul.mubr.msk.f32.gmra.mrb[24].mxu1 %vm1745_vm5, %v2384_v48 }
 0x21f   : > { %v1724_v44 = vrot.slane %v1599_v63, 1  ;;  %v2388_v26 = vrot.slane %v1599_v63, 2  ;;  %3387 = vmatprep.mubr.msk.f32.mxu0 %vm1745_vm5, %v4714_v62  ;;  %3495 = vmatprep.mubr.msk.f32.mxu1 %vm1745_vm5, %v4719_v42  ;;  %v2395_v42 = vrot.slane %v4752_v12, 2 }
 0x220   : > { %v1450_v33 = vpop.permute.xlu1 %1449  ;;  %v1304_v13 = vpop.permute.xlu0 %1303 }
 0x221   : > { %v1553_v16 = vsel %vm1511_vm3, %v5264_v51, %v1304_v13  ;;  %v1725_v22 = vsel %vm1660_vm6, %v5266_v52, %v1724_v44  ;;  %v2389_v62 = vsel %vm2324_vm7, %v5267_v20, %v2388_v26  ;;  %v2397_v56 = vsel %vm2324_vm7, %v2395_v42, %v2396_v27 }
 0x222   : > { %v1602_v35 = vsel %vm1560_vm4, %v1553_v16, %v1450_v33  ;;  %3388 = vmatmul.mubr.msk.f32.gmra.mrb[58].mxu0 %vm1745_vm5, %v1725_v22  ;;  %3496 = vmatmul.mubr.msk.f32.gmra.mrb[26].mxu1 %vm1745_vm5, %v2389_v62 }
 0x223   : > { %v1729_v50 = vrot.slane %v1602_v35, 1  ;;  %v2393_v55 = vrot.slane %v1602_v35, 2  ;;  %3390 = vmatprep.mubr.msk.f32.mxu0 %vm1745_vm5, %v4737_v18  ;;  %3498 = vmatprep.mubr.msk.f32.mxu1 %vm1745_vm5, %v4742_v38  ;;  %v1737_v18 = vrot.slane %v4771_v15, 1 }
 0x224   : > { %v1456_v34 = vpop.permute.xlu1 %1455  ;;  %v1310_v40 = vpop.permute.xlu0 %1309 }
 0x225   : > { %v1556_v54 = vsel %vm1511_vm3, %v5268_v19, %v1310_v40  ;;  %v1730_v12 = vsel %vm1660_vm6, %v1727_v45, %v1729_v50  ;;  %v2394_v39 = vsel %vm2324_vm7, %v2391_v46, %v2393_v55  ;;  %v1736_v46 = vrot.slane %v4762_v9, 1 }
 0x226   : > { %v1605_v38 = vsel %vm1560_vm4, %v1556_v54, %v1456_v34  ;;  %3391 = vmatmul.mubr.msk.f32.gmra.mrb[60].mxu0 %vm1745_vm5, %v1730_v12  ;;  %3499 = vmatmul.mubr.msk.f32.gmra.mrb[28].mxu1 %vm1745_vm5, %v2394_v39  ;;  %v2402_v9 = vsel %vm2324_vm7, %v2400_v25, %v2401_v4 }
 0x227   : > { %v1734_v32 = vrot.slane %v1605_v38, 1  ;;  %v2398_v45 = vrot.slane %v1605_v38, 2  ;;  %3393 = vmatprep.mubr.msk.f32.mxu0 %vm1745_vm5, %v1733_v60  ;;  %3501 = vmatprep.mubr.msk.f32.mxu1 %vm1745_vm5, %v2397_v56  ;;  %v1738_v14 = vsel %vm1660_vm6, %v1736_v46, %v1737_v18 }
 0x228   : > { %v1462_v61 = vpop.permute.xlu1 %1461  ;;  %v1316_v15 = vpop.permute.xlu0 %1315 }
 0x229   : > { %v1559_v47 = vsel %vm1511_vm3, %v5269_v0, %v1316_v15  ;;  %v1735_v58 = vsel %vm1660_vm6, %v1732_v30, %v1734_v32  ;;  %v2399_v41 = vsel %vm2324_vm7, %v2396_v27, %v2398_v45 }
 0x22a   : > { %v1608_v53 = vsel %vm1560_vm4, %v1559_v47, %v1462_v61  ;;  %3394 = vmatmul.mubr.msk.f32.gmra.mrb[62].mxu0 %vm1745_vm5, %v1735_v58  ;;  %3502 = vmatmul.mubr.msk.f32.gmra.mrb[30].mxu1 %vm1745_vm5, %v2399_v41 }
 0x22b   : > { %v1739_v29 = vrot.slane %v1608_v53, 1  ;;  %v2403_v1 = vrot.slane %v1608_v53, 2  ;;  %3396 = vmatprep.mubr.msk.f32.mxu0 %vm1745_vm5, %v1738_v14  ;;  %3504 = vmatprep.mubr.msk.f32.mxu1 %vm1745_vm5, %v2402_v9 }
 0x22d   : > { %v1740_v10 = vsel %vm1660_vm6, %v1737_v18, %v1739_v29  ;;  %v2404_v2 = vsel %vm2324_vm7, %v2401_v4, %v2403_v1 }
 0x22e   : > { %3397 = vmatmul.mubr.msk.f32.gmra.mrb[64].mxu0 %vm1745_vm5, %v1740_v10  ;;  %3505 = vmatmul.mubr.msk.f32.gmra.mrb[32].mxu1 %vm1745_vm5, %v2404_v2 }
 0x2c4   : > { %v3353_v43 = vpop.f32.mrb[34].mxu0 }
 0x2c5   : > { %v1876_v59 = vpop.f32.mrb[35].mxu0  ;;  %v3461_v21 = vpop.f32.mrb[2].mxu1 }
 0x2c6   : > { %v3519_v17 = vadd.f32 %v3461_v21, %v3353_v43  ;;  %v2539_v28 = vpop.f32.mrb[3].mxu1 }
 0x2c7   : > { %v3520_v31 = vadd.f32 %v2539_v28, %v1876_v59 }
 0x2c8   : > { %v2738_v23 = vadd.f32 %v3519_v17, %v5014_v57 }
 0x2c9   : > { %v2737_v8 = vadd.f32 %v3520_v31, %v5014_v57  ;;  %v3356_v49 = vpop.f32.mrb[36].mxu0  ;;  %v3464_v3 = vpop.f32.mrb[4].mxu1 }
 0x2ca   : > { %v2770_v5 = vmax.f32 %v2738_v23, 0.0  ;;  %v3521_v7 = vadd.f32 %v3464_v3, %v3356_v49  ;;  %v1886_v11 = vpop.f32.mrb[37].mxu0  ;;  %v2549_v6 = vpop.f32.mrb[5].mxu1 }
 0x2cb   : > { %v2769_v24 = vmax.f32 %v2737_v8, 0.0  ;;  %v3522_v48 = vadd.f32 %v2549_v6, %v1886_v11 }
 0x2cc   : > { %2803 = vst.msk [vmem:[%s5020_s17 + $0x8] sm:$0xff] %vm2801_vm8, %v2770_v5  ;;  %v2740_v63 = vadd.f32 %v3521_v7, %v5014_v57 }
 0x2cd   : > { %2802 = vst.msk [vmem:[%s5020_s17] sm:$0xff] %vm2801_vm8, %v2769_v24  ;;  %v2739_v44 = vadd.f32 %v3522_v48, %v5014_v57  ;;  %v3359_v26 = vpop.f32.mrb[38].mxu0  ;;  %v3467_v30 = vpop.f32.mrb[6].mxu1 }
 0x2ce   : > { %v2772_v33 = vmax.f32 %v2740_v63, 0.0  ;;  %v3523_v13 = vadd.f32 %v3467_v30, %v3359_v26  ;;  %v1896_v36 = vpop.f32.mrb[39].mxu0  ;;  %v2559_v51 = vpop.f32.mrb[7].mxu1 }
 0x2cf   : > { %v2771_v16 = vmax.f32 %v2739_v44, 0.0  ;;  %v3524_v37 = vadd.f32 %v2559_v51, %v1896_v36 }
 0x2d0   : > { %2805 = vst.msk [vmem:[%s5020_s17 + $0x18] sm:$0xff] %vm2801_vm8, %v2772_v33  ;;  %v2742_v52 = vadd.f32 %v3523_v13, %v5014_v57 }
 0x2d1   : > { %2804 = vst.msk [vmem:[%s5020_s17 + $0x10] sm:$0xff] %vm2801_vm8, %v2771_v16  ;;  %v2741_v22 = vadd.f32 %v3524_v37, %v5014_v57  ;;  %v3362_v20 = vpop.f32.mrb[40].mxu0  ;;  %v3470_v62 = vpop.f32.mrb[8].mxu1 }
 0x2d2   : > { %v2774_v27 = vmax.f32 %v2742_v52, 0.0  ;;  %v3525_v42 = vadd.f32 %v3470_v62, %v3362_v20  ;;  %v1906_v35 = vpop.f32.mrb[41].mxu0  ;;  %v2569_v50 = vpop.f32.mrb[9].mxu1 }
 0x2d3   : > { %v2773_v55 = vmax.f32 %v2741_v22, 0.0  ;;  %v3526_v34 = vadd.f32 %v2569_v50, %v1906_v35 }
 0x2d4   : > { %2807 = vst.msk [vmem:[%s5020_s17 + $0x28] sm:$0xff] %vm2801_vm8, %v2774_v27  ;;  %v2744_v40 = vadd.f32 %v3525_v42, %v5014_v57 }
 0x2d5   : > { %2806 = vst.msk [vmem:[%s5020_s17 + $0x20] sm:$0xff] %vm2801_vm8, %v2773_v55  ;;  %v2743_v19 = vadd.f32 %v3526_v34, %v5014_v57  ;;  %v3365_v54 = vpop.f32.mrb[42].mxu0  ;;  %v3473_v12 = vpop.f32.mrb[10].mxu1 }
 0x2d6   : > { %v2776_v39 = vmax.f32 %v2744_v40, 0.0  ;;  %v3527_v60 = vadd.f32 %v3473_v12, %v3365_v54  ;;  %v1916_v18 = vpop.f32.mrb[43].mxu0  ;;  %v2579_v4 = vpop.f32.mrb[11].mxu1 }
 0x2d7   : > { %v2775_v38 = vmax.f32 %v2743_v19, 0.0  ;;  %v3528_v56 = vadd.f32 %v2579_v4, %v1916_v18 }
 0x2d8   : > { %2809 = vst.msk [vmem:[%s5020_s17 + $0x38] sm:$0xff] %vm2801_vm8, %v2776_v39  ;;  %v2746_v32 = vadd.f32 %v3527_v60, %v5014_v57 }
 0x2d9   : > { %2808 = vst.msk [vmem:[%s5020_s17 + $0x30] sm:$0xff] %vm2801_vm8, %v2775_v38  ;;  %v2745_v45 = vadd.f32 %v3528_v56, %v5014_v57  ;;  %v3368_v46 = vpop.f32.mrb[44].mxu0  ;;  %v3476_v25 = vpop.f32.mrb[12].mxu1 }
 0x2da   : > { %v2778_v61 = vmax.f32 %v2746_v32, 0.0  ;;  %v3529_v15 = vadd.f32 %v3476_v25, %v3368_v46  ;;  %v1926_v0 = vpop.f32.mrb[45].mxu0  ;;  %v2589_v47 = vpop.f32.mrb[13].mxu1 }
 0x2db   : > { %v2777_v58 = vmax.f32 %v2745_v45, 0.0  ;;  %v3530_v41 = vadd.f32 %v2589_v47, %v1926_v0 }
 0x2dc   : > { %2811 = vst.msk [vmem:[%s5020_s17 + $0x48] sm:$0xff] %vm2801_vm8, %v2778_v61  ;;  %v2748_v53 = vadd.f32 %v3529_v15, %v5014_v57 }
 0x2dd   : > { %2810 = vst.msk [vmem:[%s5020_s17 + $0x40] sm:$0xff] %vm2801_vm8, %v2777_v58  ;;  %v2747_v14 = vadd.f32 %v3530_v41, %v5014_v57  ;;  %v3371_v9 = vpop.f32.mrb[46].mxu0  ;;  %v3479_v29 = vpop.f32.mrb[14].mxu1 }
 0x2de   : > { %v2780_v1 = vmax.f32 %v2748_v53, 0.0  ;;  %v3531_v10 = vadd.f32 %v3479_v29, %v3371_v9  ;;  %v1936_v2 = vpop.f32.mrb[47].mxu0  ;;  %v2599_v43 = vpop.f32.mrb[15].mxu1 }
 0x2df   : > { %v2779_v59 = vmax.f32 %v2747_v14, 0.0  ;;  %v3532_v21 = vadd.f32 %v2599_v43, %v1936_v2 }
 0x2e0   : > { %2813 = vst.msk [vmem:[%s5020_s17 + $0x58] sm:$0xff] %vm2801_vm8, %v2780_v1  ;;  %v2750_v17 = vadd.f32 %v3531_v10, %v5014_v57 }
 0x2e1   : > { %2812 = vst.msk [vmem:[%s5020_s17 + $0x50] sm:$0xff] %vm2801_vm8, %v2779_v59  ;;  %v2749_v28 = vadd.f32 %v3532_v21, %v5014_v57  ;;  %v3374_v31 = vpop.f32.mrb[48].mxu0  ;;  %v3482_v23 = vpop.f32.mrb[16].mxu1 }
 0x2e2   : > { %v2782_v8 = vmax.f32 %v2750_v17, 0.0  ;;  %v3533_v49 = vadd.f32 %v3482_v23, %v3374_v31  ;;  %v1946_v3 = vpop.f32.mrb[49].mxu0  ;;  %v2609_v5 = vpop.f32.mrb[17].mxu1 }
 0x2e3   : > { %v2781_v7 = vmax.f32 %v2749_v28, 0.0  ;;  %v3534_v11 = vadd.f32 %v2609_v5, %v1946_v3 }
 0x2e4   : > { %2815 = vst.msk [vmem:[%s5020_s17 + $0x68] sm:$0xff] %vm2801_vm8, %v2782_v8  ;;  %v2752_v6 = vadd.f32 %v3533_v49, %v5014_v57 }
 0x2e5   : > { %2814 = vst.msk [vmem:[%s5020_s17 + $0x60] sm:$0xff] %vm2801_vm8, %v2781_v7  ;;  %v2751_v24 = vadd.f32 %v3534_v11, %v5014_v57  ;;  %v3377_v48 = vpop.f32.mrb[50].mxu0  ;;  %v3485_v63 = vpop.f32.mrb[18].mxu1 }
 0x2e6   : > { %v2784_v44 = vmax.f32 %v2752_v6, 0.0  ;;  %v3535_v26 = vadd.f32 %v3485_v63, %v3377_v48  ;;  %v1956_v30 = vpop.f32.mrb[51].mxu0  ;;  %v2619_v33 = vpop.f32.mrb[19].mxu1 }
 0x2e7   : > { %v2783_v13 = vmax.f32 %v2751_v24, 0.0  ;;  %v3536_v36 = vadd.f32 %v2619_v33, %v1956_v30 }
 0x2e8   : > { %2817 = vst.msk [vmem:[%s5020_s17 + $0x78] sm:$0xff] %vm2801_vm8, %v2784_v44  ;;  %v2754_v51 = vadd.f32 %v3535_v26, %v5014_v57 }
 0x2e9   : > { %2816 = vst.msk [vmem:[%s5020_s17 + $0x70] sm:$0xff] %vm2801_vm8, %v2783_v13  ;;  %v2753_v16 = vadd.f32 %v3536_v36, %v5014_v57  ;;  %v3380_v37 = vpop.f32.mrb[52].mxu0  ;;  %v3488_v52 = vpop.f32.mrb[20].mxu1 }
 0x2ea   : > { %v2786_v22 = vmax.f32 %v2754_v51, 0.0  ;;  %v3537_v20 = vadd.f32 %v3488_v52, %v3380_v37  ;;  %v1966_v62 = vpop.f32.mrb[53].mxu0  ;;  %v2629_v27 = vpop.f32.mrb[21].mxu1 }
 0x2eb   : > { %v2785_v42 = vmax.f32 %v2753_v16, 0.0  ;;  %v3538_v35 = vadd.f32 %v2629_v27, %v1966_v62 }
 0x2ec   : > { %2819 = vst.msk [vmem:[%s5020_s17 + $0x88] sm:$0xff] %vm2801_vm8, %v2786_v22  ;;  %v2756_v50 = vadd.f32 %v3537_v20, %v5014_v57 }
 0x2ed   : > { %2818 = vst.msk [vmem:[%s5020_s17 + $0x80] sm:$0xff] %vm2801_vm8, %v2785_v42  ;;  %v2755_v55 = vadd.f32 %v3538_v35, %v5014_v57  ;;  %v3383_v34 = vpop.f32.mrb[54].mxu0  ;;  %v3491_v40 = vpop.f32.mrb[22].mxu1 }
 0x2ee   : > { %v2788_v19 = vmax.f32 %v2756_v50, 0.0  ;;  %v3539_v54 = vadd.f32 %v3491_v40, %v3383_v34  ;;  %v1976_v12 = vpop.f32.mrb[55].mxu0  ;;  %v2639_v39 = vpop.f32.mrb[23].mxu1 }
 0x2ef   : > { %v2787_v60 = vmax.f32 %v2755_v55, 0.0  ;;  %v3540_v18 = vadd.f32 %v2639_v39, %v1976_v12 }
 0x2f0   : > { %2821 = vst.msk [vmem:[%s5020_s17 + $0x98] sm:$0xff] %vm2801_vm8, %v2788_v19  ;;  %v2758_v4 = vadd.f32 %v3539_v54, %v5014_v57 }
 0x2f1   : > { %2820 = vst.msk [vmem:[%s5020_s17 + $0x90] sm:$0xff] %vm2801_vm8, %v2787_v60  ;;  %v2757_v38 = vadd.f32 %v3540_v18, %v5014_v57  ;;  %v3386_v56 = vpop.f32.mrb[56].mxu0  ;;  %v3494_v32 = vpop.f32.mrb[24].mxu1 }
 0x2f2   : > { %v2790_v45 = vmax.f32 %v2758_v4, 0.0  ;;  %v3541_v46 = vadd.f32 %v3494_v32, %v3386_v56  ;;  %v1986_v25 = vpop.f32.mrb[57].mxu0  ;;  %v2649_v61 = vpop.f32.mrb[25].mxu1 }
 0x2f3   : > { %v2789_v15 = vmax.f32 %v2757_v38, 0.0  ;;  %v3542_v0 = vadd.f32 %v2649_v61, %v1986_v25 }
 0x2f4   : > { %2823 = vst.msk [vmem:[%s5020_s17 + $0xa8] sm:$0xff] %vm2801_vm8, %v2790_v45  ;;  %v2760_v47 = vadd.f32 %v3541_v46, %v5014_v57 }
 0x2f5   : > { %2822 = vst.msk [vmem:[%s5020_s17 + $0xa0] sm:$0xff] %vm2801_vm8, %v2789_v15  ;;  %v2759_v58 = vadd.f32 %v3542_v0, %v5014_v57  ;;  %v3389_v41 = vpop.f32.mrb[58].mxu0  ;;  %v3497_v53 = vpop.f32.mrb[26].mxu1 }
 0x2f6   : > { %v2792_v14 = vmax.f32 %v2760_v47, 0.0  ;;  %v3543_v9 = vadd.f32 %v3497_v53, %v3389_v41  ;;  %v1996_v29 = vpop.f32.mrb[59].mxu0  ;;  %v2659_v1 = vpop.f32.mrb[27].mxu1 }
 0x2f7   : > { %v2791_v10 = vmax.f32 %v2759_v58, 0.0  ;;  %v3544_v2 = vadd.f32 %v2659_v1, %v1996_v29 }
 0x2f8   : > { %2825 = vst.msk [vmem:[%s5020_s17 + $0xb8] sm:$0xff] %vm2801_vm8, %v2792_v14  ;;  %v2762_v43 = vadd.f32 %v3543_v9, %v5014_v57 }
 0x2f9   : > { %2824 = vst.msk [vmem:[%s5020_s17 + $0xb0] sm:$0xff] %vm2801_vm8, %v2791_v10  ;;  %v2761_v59 = vadd.f32 %v3544_v2, %v5014_v57  ;;  %v3392_v21 = vpop.f32.mrb[60].mxu0  ;;  %v3500_v17 = vpop.f32.mrb[28].mxu1 }
 0x2fa   : > { %v2794_v28 = vmax.f32 %v2762_v43, 0.0  ;;  %v3545_v31 = vadd.f32 %v3500_v17, %v3392_v21  ;;  %v2006_v23 = vpop.f32.mrb[61].mxu0  ;;  %v2669_v8 = vpop.f32.mrb[29].mxu1 }
 0x2fb   : > { %v2793_v49 = vmax.f32 %v2761_v59, 0.0  ;;  %v3546_v3 = vadd.f32 %v2669_v8, %v2006_v23 }
 0x2fc   : > { %2827 = vst.msk [vmem:[%s5020_s17 + $0xc8] sm:$0xff] %vm2801_vm8, %v2794_v28  ;;  %v2764_v5 = vadd.f32 %v3545_v31, %v5014_v57 }
 0x2fd   : > { %2826 = vst.msk [vmem:[%s5020_s17 + $0xc0] sm:$0xff] %vm2801_vm8, %v2793_v49  ;;  %v2763_v7 = vadd.f32 %v3546_v3, %v5014_v57  ;;  %v3395_v11 = vpop.f32.mrb[62].mxu0  ;;  %v3503_v6 = vpop.f32.mrb[30].mxu1 }
 0x2fe   : > { %v2796_v24 = vmax.f32 %v2764_v5, 0.0  ;;  %v3547_v48 = vadd.f32 %v3503_v6, %v3395_v11  ;;  %v2016_v63 = vpop.f32.mrb[63].mxu0  ;;  %v2679_v44 = vpop.f32.mrb[31].mxu1 }
 0x2ff   : > { %v2795_v26 = vmax.f32 %v2763_v7, 0.0  ;;  %v3548_v30 = vadd.f32 %v2679_v44, %v2016_v63 }
 0x300   : > { %2829 = vst.msk [vmem:[%s5020_s17 + $0xd8] sm:$0xff] %vm2801_vm8, %v2796_v24  ;;  %v2766_v33 = vadd.f32 %v3547_v48, %v5014_v57 }
 0x301   : > { %2828 = vst.msk [vmem:[%s5020_s17 + $0xd0] sm:$0xff] %vm2801_vm8, %v2795_v26  ;;  %v2765_v13 = vadd.f32 %v3548_v30, %v5014_v57  ;;  %v3398_v36 = vpop.f32.mrb[64].mxu0  ;;  %v3506_v51 = vpop.f32.mrb[32].mxu1 }
 0x302   : > { %v2798_v16 = vmax.f32 %v2766_v33, 0.0  ;;  %v3549_v37 = vadd.f32 %v3506_v51, %v3398_v36  ;;  %v2026_v52 = vpop.f32.mrb[65].mxu0  ;;  %v2689_v22 = vpop.f32.mrb[33].mxu1 }
 0x303   : > { %v2797_v20 = vmax.f32 %v2765_v13, 0.0  ;;  %v3550_v62 = vadd.f32 %v2689_v22, %v2026_v52 }
 0x304   : > { %2831 = vst.msk [vmem:[%s5020_s17 + $0xe8] sm:$0xff] %vm2801_vm8, %v2798_v16  ;;  %v2768_v27 = vadd.f32 %v3549_v37, %v5014_v57 }
 0x305   : > { %2830 = vst.msk [vmem:[%s5020_s17 + $0xe0] sm:$0xff] %vm2801_vm8, %v2797_v20  ;;  %v2767_v42 = vadd.f32 %v3550_v62, %v5014_v57 }
 0x306   : > { %v2800_v35 = vmax.f32 %v2768_v27, 0.0 }
 0x307   : > { %v2799_v50 = vmax.f32 %v2767_v42, 0.0 }
 0x308   : > { %2833 = vst.msk [vmem:[%s5020_s17 + $0xf8] sm:$0xff] %vm2801_vm8, %v2800_v35 }
 0x309   : > { %2832 = vst.msk [vmem:[%s5020_s17 + $0xf0] sm:$0xff] %vm2801_vm8, %v2799_v50 }
 0x30a   : > { %3654 = shalt.err (!%p3651_p5)
}
 0x30b   : > { %s3655_s8 = scalar_lea.hbm %s5117_s21, 4096  ;;  %s3659_s19 = scalar_lea.hbm %s5181_s7, 8192 }
 0x30c   : > { %p3656_p6 = scmp.ne.s32.totalorder %s5117_s21, %s3655_s8  ;;  %p3660_p10 = scmp.lt.u32.totalorder %s5117_s21, %s5181_s7 }
 0x30d   : > { %p3661_p11 = scmp.lt.u32.totalorder %s3659_s19, %s3655_s8  ;;  %p3663_p13 = scmp.lt.u32.totalorder %s3655_s8, %s5117_s21 }
 0x30e   : > { %p3657_p7 = pnand %p3656_p6, %p3805_p4 }
 0x30f   : > { %p3662_p12 = por %p3661_p11, %p3660_p10 }
 0x310   : > { %p3658_p9 = pneg %p3657_p7 }
 0x311   : > { %p3664_p0 = por %p3663_p13, %p3662_p12 }
 0x313   : > { %p3665_p1 = pnand %p3664_p0, %p3658_p9 }
 0x315   : > { %3668 = shalt.err (!%p3665_p1)
}
 0x316   : > { %s3724_s23 = smov 128  }
 0x317   : > { %3583 = dma.vmem_to_hbm [thread:$0]  (%p3805_p4), %s5119_s20, 4096, %s5117_s21, %s5127_s27, %s3724_s23, %s3724_s23, %s3721_s30  }
 0x318 PF: > { %p3589_p2 = scmp.ge.s32.totalorder %s3719_s29, 2  ;;  %s2866_s10 = sand.u32 1, %s3699_s24  }
 0x319   : > { %s2867_s12 = scalar_lea.sflag [#allocation3], %s2866_s10 }
 0x31a   : > { %p3586_p3 = pnand %p3589_p2, %p3812_p8 }
 0x31c   : > { %3694 = dma.done.wait (!%p3586_p3), %s2867_s12, 4096  }
 0x31d   : > { %3696 = vsyncadd (!%p3586_p3), %s2867_s12, 4294963200  ;;  %s20_s29 = sadd.s32 1, %s3719_s29   ;;  %s5270_s24 = smov %s3703_s25 }
 0x31e   : > { %p17_p5 = scmp.ge.s32.totalorder %s20_s29, 4   ;;  %s5271_s25 = smov %s3707_s26 }
 0x31f   : > { %s5272_s26 = smov %s3818_s14  ;;  %s5273_s27 = smov %s3715_s28 }
 0x320   : > { %s5274_s28 = smov %s5276_s9  ;;  %19 = sbr.rel (!%p17_p5) target bundleno = 4 (0x4), region = 91 }
 0x327   :  { %2872 = vsyncpa [#allocation3], 1 }
 0x328   :  { %2874 = vsyncpa [#allocation3 + $0x1], 1 }

</bundles_post_ra>
